<compile_context>
chip_gen: v7x
topology: tpu7x:2x2x1
jax: 0.10.0
libtpu: 0.0.40
codegen_flags: <defaults>
</compile_context>

<pallas_src>
from functools import partial
from math import sqrt

import jax
import jax.numpy as jnp
from jax.experimental import pallas as pl
from jax.experimental.pallas import tpu as pltpu

D_MODEL = 128       # lane-dense small stand-in for 768
N_HEAD = 4          # matches KnowledgeEncoderBlock(nhead=4)
HEAD_DIM = D_MODEL // N_HEAD
D_FF = 256          # small stand-in for default dim_feedforward=2048
N_LAYERS = 4        # len(self.encoding_layers)
LN_EPS = 1e-5


def _nbytes(a):
    return int(a.size) * int(a.dtype.itemsize)


def _layer_norm(x, w, b):
    mean = jnp.mean(x, axis=-1, keepdims=True)
    var = jnp.mean((x - mean) ** 2, axis=-1, keepdims=True)   # biased, like torch LN
    return (x - mean) * jax.lax.rsqrt(var + LN_EPS) * w + b


def fused_knowledge_encoder_kernel(x_ref, kh_ref, wq_ref, wkv_ref, wo_ref,
                                   w1_ref, w2_ref, vecd_ref, bkv_ref, b1_ref,
                                   out_ref, *, nhead):
    """Grid = (batch_blocks, n_layers). out_ref is resident across the layer axis."""
    layer = pl.program_id(1)

    # Initialize the resident activation slab from the input at the first layer.
    # (x is only read here; its block index never changes within a batch block so it
    #  is DMA'd once per batch block.)
    @pl.when(layer == 0)
    def _():
        out_ref[...] = x_ref[...]

    bb, s, d = out_ref.shape        # block shape (static)
    hd = d // nhead
    r = bb * s
    cdt = wq_ref.dtype              # matmul compute dtype (bf16 by default)

    x2 = out_ref[...].reshape(r, d)     # current activations, (R, D) f32
    kh2 = kh_ref[0].reshape(r, d)       # this layer's knowledge attention head, f32

    # Layer-resident packed weights (block covers all layers; index the layer here).
    wq = wq_ref[layer]                  # (D, D)   Wq^T
    wkv = wkv_ref[layer]                # (D, 2D)  [Wk^T | Wv^T]
    wo = wo_ref[layer]                  # (D, D)   Wo^T
    w1 = w1_ref[layer]                  # (D, F)   W1^T
    w2 = w2_ref[layer]                  # (F, D)   W2^T

    # Packed per-layer vectors: rows = [bq, bo, ln1w, ln1b, ln2w, ln2b, b2, pad] (f32).
    vd = vecd_ref[layer]                # (8, D)
    bq, bo = vd[0:1], vd[1:2]
    ln1w, ln1b = vd[2:3], vd[3:4]
    ln2w, ln2b = vd[4:5], vd[5:6]
    b2 = vd[6:7]
    bkv = bkv_ref[layer]                # (1, 2D) = [bk | bv]
    b1 = b1_ref[layer]                  # (1, F)

    # --- projections (bf16 MXU, f32 accumulation, f32 bias add) ---
    q = jnp.dot(x2.astype(cdt), wq, preferred_element_type=jnp.float32) + bq     # (R, D)
    kv = jnp.dot(kh2.astype(cdt), wkv, preferred_element_type=jnp.float32) + bkv  # (R, 2D)
    k = kv[:, :d]
    v = kv[:, d:]

    # Fold the attention scale into q once: O(R*D) VPU work instead of O(N*S*S).
    q = q * (1.0 / sqrt(hd))

    # --- head split: nhead static lane slices + one leading concat per tensor ---
    q3 = q.reshape(bb, s, d)
    k3 = k.reshape(bb, s, d)
    v3 = v.reshape(bb, s, d)
    qh = jnp.concatenate([q3[:, :, h * hd:(h + 1) * hd] for h in range(nhead)],
                         axis=0).astype(cdt)          # (nhead*bb, S, hd), n = h*bb + b
    khh = jnp.concatenate([k3[:, :, h * hd:(h + 1) * hd] for h in range(nhead)],
                          axis=0).astype(cdt)
    vh = jnp.concatenate([v3[:, :, h * hd:(h + 1) * hd] for h in range(nhead)],
                         axis=0).astype(cdt)

    # --- head-batched cross attention with a single batched softmax (f32) ---
    # TODO(synk): at real S, flash-tile over KV blocks and pad the KV dim to 128.
    scores = jnp.einsum('nqd,nkd->nqk', qh, khh,
                        preferred_element_type=jnp.float32)                      # (N,S,S)
    scores = scores - jnp.max(scores, axis=-1, keepdims=True)
    p = jnp.exp(scores)
    p = p * pl.reciprocal(jnp.sum(p, axis=-1, keepdims=True))   # exact reciprocal
    ctx = jnp.einsum('nqk,nkd->nqd', p.astype(cdt), vh,
                     preferred_element_type=jnp.float32)                         # (N,S,hd)

    # --- head merge: nhead static leading slices + one lane concat ---
    attn = jnp.concatenate([ctx[h * bb:(h + 1) * bb] for h in range(nhead)],
                           axis=-1).reshape(r, d)                                # (R, D)
    attn = jnp.dot(attn.astype(cdt), wo, preferred_element_type=jnp.float32) + bo

    # --- residual + LayerNorm1 (post-norm, f32) ---
    x1 = _layer_norm(x2 + attn, ln1w, ln1b)

    # --- feed-forward (ReLU, default activation of nn.TransformerEncoderLayer) ---
    h1 = jnp.maximum(
        jnp.dot(x1.astype(cdt), w1, preferred_element_type=jnp.float32) + b1, 0.0)
    ff = jnp.dot(h1.astype(cdt), w2, preferred_element_type=jnp.float32) + b2

    # --- residual + LayerNorm2; result stays resident for the next layer ---
    out_ref[...] = _layer_norm(x1 + ff, ln2w, ln2b).reshape(bb, s, d)


# ---------------------------------------------------------------------------
# Parameter handling (PyTorch conventions kept in the per-layer dicts; all
# transposition / packing / casting happens once here, outside the kernel).
# ---------------------------------------------------------------------------
def init_layer_params(key):
    ks = jax.random.split(key, 6)
    sc = 1.0 / sqrt(D_MODEL)
    return dict(
        wq=jax.random.normal(ks[0], (D_MODEL, D_MODEL), jnp.float32) * sc,
        wk=jax.random.normal(ks[1], (D_MODEL, D_MODEL), jnp.float32) * sc,
        wv=jax.random.normal(ks[2], (D_MODEL, D_MODEL), jnp.float32) * sc,
        wo=jax.random.normal(ks[3], (D_MODEL, D_MODEL), jnp.float32) * sc,
        w1=jax.random.normal(ks[4], (D_FF, D_MODEL), jnp.float32) * sc,
        w2=jax.random.normal(ks[5], (D_MODEL, D_FF), jnp.float32) / sqrt(D_FF),
        bq=jnp.zeros((D_MODEL,), jnp.float32),
        bk=jnp.zeros((D_MODEL,), jnp.float32),
        bv=jnp.zeros((D_MODEL,), jnp.float32),
        bo=jnp.zeros((D_MODEL,), jnp.float32),
        b1=jnp.zeros((D_FF,), jnp.float32),
        b2=jnp.zeros((D_MODEL,), jnp.float32),
        ln1w=jnp.ones((D_MODEL,), jnp.float32),
        ln1b=jnp.zeros((D_MODEL,), jnp.float32),
        ln2w=jnp.ones((D_MODEL,), jnp.float32),
        ln2b=jnp.zeros((D_MODEL,), jnp.float32),
    )


def pack_layer_params(layer_params, compute_dtype=jnp.bfloat16):
    zero_d = jnp.zeros((D_MODEL,), jnp.float32)
    wq = jnp.stack([p['wq'].T for p in layer_params]).astype(compute_dtype)      # (L,D,D)
    wkv = jnp.stack([jnp.concatenate([p['wk'].T, p['wv'].T], axis=1)
                     for p in layer_params]).astype(compute_dtype)               # (L,D,2D)
    wo = jnp.stack([p['wo'].T for p in layer_params]).astype(compute_dtype)      # (L,D,D)
    w1 = jnp.stack([p['w1'].T for p in layer_params]).astype(compute_dtype)      # (L,D,F)
    w2 = jnp.stack([p['w2'].T for p in layer_params]).astype(compute_dtype)      # (L,F,D)
    vecd = jnp.stack([jnp.stack([p['bq'], p['bo'], p['ln1w'], p['ln1b'],
                                 p['ln2w'], p['ln2b'], p['b2'], zero_d])
                      for p in layer_params])                                    # (L,8,D) f32
    bkv = jnp.stack([jnp.concatenate([p['bk'], p['bv']])[None, :]
                     for p in layer_params])                                     # (L,1,2D) f32
    b1 = jnp.stack([p['b1'][None, :] for p in layer_params])                     # (L,1,F) f32
    return wq, wkv, wo, w1, w2, vecd, bkv, b1


def knowledge_attention_encoder_forward(x, knowledge_attn_heads, layer_params,
                                        batch_block=None,
                                        compute_dtype=jnp.bfloat16):
    # TODO(synk): T5EncoderModel / AutoTokenizer require a pretrained checkpoint and
    # have no Pallas equivalent; `x` is assumed to already be the encoder's
    # last_hidden_state (B, S, D).  The returned `tokenized.attention_mask` from the
    # original forward is likewise omitted.
    n_layers = len(layer_params)
    assert len(knowledge_attn_heads) == n_layers, \
        'Number of attention encoding layers does not match number of knowledge attention heads'
    B, S, D = x.shape

    if batch_block is None:
        # >=2 parallel batch blocks so both v7x TensorCores get work.
        bb = B // 2 if (B >= 2 and B % 2 == 0) else B
    else:
        bb = batch_block
    assert B % bb == 0

    kh = jnp.stack(knowledge_attn_heads)             # (L, B, S, D)
    wq, wkv, wo, w1, w2, vecd, bkv, b1 = pack_layer_params(layer_params, compute_dtype)
    L = n_layers
    F_ = w1.shape[-1]
    H = N_HEAD
    hd = D // H

    # --- scheduling hint for XLA around the fused kernel ---
    per_layer_mm_flops = 2 * B * S * D * (4 * D + 2 * F_)       # q/k/v/o proj + FFN
    per_layer_attn_flops = 4 * B * H * S * S * hd               # QK^T + PV
    flops = int(L * (per_layer_mm_flops + per_layer_attn_flops))
    transcendentals = int(L * B * H * S * S)                    # softmax exp
    bytes_accessed = int(sum(_nbytes(a) for a in
                             (x, kh, wq, wkv, wo, w1, w2, vecd, bkv, b1)) + _nbytes(x))

    # --- explicit scoped-VMEM budget (resident weights + pipelined blocks + temps) ---
    weight_bytes = sum(_nbytes(a) for a in (wq, wkv, wo, w1, w2, vecd, bkv, b1))
    act_block = bb * S * D * 4
    scores_block = bb * H * S * S * 4
    vmem_needed = (2 * weight_bytes + 4 * act_block              # weights + x/kh buffers
                   + act_block                                   # resident output slab
                   + 12 * act_block + 4 * scores_block)          # q/kv/ffn/softmax temps
    # TODO(synk): at 768/2048 this must instead drive KV/FFN tiling on v7x (64 MiB/TC).
    vmem_limit = int(min(max(vmem_needed, 32 * 1024 * 1024), 128 * 1024 * 1024))

    grid = (B // bb, L)                              # (parallel batch blocks, layers)
    kernel = partial(fused_knowledge_encoder_kernel, nhead=H)

    return pl.pallas_call(
        kernel,
        out_shape=jax.ShapeDtypeStruct((B, S, D), jnp.float32),
        grid=grid,
        in_specs=[
            pl.BlockSpec((bb, S, D), lambda b, l: (b, 0, 0)),        # x (read at l==0)
            pl.BlockSpec((1, bb, S, D), lambda b, l: (l, b, 0, 0)),  # stacked kh
            # Layer-invariant weight blocks: loaded once, resident for the whole kernel.
            pl.BlockSpec((L, D, D), lambda b, l: (0, 0, 0)),         # Wq^T
            pl.BlockSpec((L, D, 2 * D), lambda b, l: (0, 0, 0)),     # [Wk^T | Wv^T]
            pl.BlockSpec((L, D, D), lambda b, l: (0, 0, 0)),         # Wo^T
            pl.BlockSpec((L, D, F_), lambda b, l: (0, 0, 0)),        # W1^T
            pl.BlockSpec((L, F_, D), lambda b, l: (0, 0, 0)),        # W2^T
            pl.BlockSpec((L, 8, D), lambda b, l: (0, 0, 0)),         # packed D-vectors
            pl.BlockSpec((L, 1, 2 * D), lambda b, l: (0, 0, 0)),     # [bk | bv]
            pl.BlockSpec((L, 1, F_), lambda b, l: (0, 0, 0)),        # b1
        ],
        # Same block index across the layer axis -> x stays resident in VMEM.
        out_specs=pl.BlockSpec((bb, S, D), lambda b, l: (b, 0, 0)),
        compiler_params=pltpu.CompilerParams(
            dimension_semantics=("parallel", "arbitrary"),
            vmem_limit_bytes=vmem_limit),
        cost_estimate=pl.CostEstimate(flops=flops,
                                      transcendentals=transcendentals,
                                      bytes_accessed=bytes_accessed),
    )(x, kh, wq, wkv, wo, w1, w2, vecd, bkv, b1)


# ---------------------------------------------------------------------------
# Pure-JAX reference (PyTorch eval-mode semantics).  `matmul_dtype` lets us build a
# precision-matched reference (bf16 MXU operands, f32 accumulation) for a tight check,
# and a full-f32 reference for a sanity check.
# ---------------------------------------------------------------------------
def _reference_forward(x, knowledge_attn_heads, layer_params,
                       matmul_dtype=jnp.float32):
    cdt = matmul_dtype

    def mm(a, b):
        return jnp.matmul(a.astype(cdt), b.astype(cdt),
                          preferred_element_type=jnp.float32)

    def ln(t, w, b):
        mu = jnp.mean(t, axis=-1, keepdims=True)
        var = jnp.mean((t - mu) ** 2, axis=-1, keepdims=True)
        return (t - mu) / jnp.sqrt(var + LN_EPS) * w + b

    for p, kh in zip(layer_params, knowledge_attn_heads):
        B, S, D = x.shape
        q = (mm(x, p['wq'].T) + p['bq']) * (1.0 / sqrt(HEAD_DIM))   # torch scales q
        k = mm(kh, p['wk'].T) + p['bk']
        v = mm(kh, p['wv'].T) + p['bv']
        qh = q.reshape(B, S, N_HEAD, HEAD_DIM)
        kh4 = k.reshape(B, S, N_HEAD, HEAD_DIM)
        vh = v.reshape(B, S, N_HEAD, HEAD_DIM)
        sc = jnp.einsum('bqhd,bkhd->bhqk', qh.astype(cdt), kh4.astype(cdt),
                        preferred_element_type=jnp.float32)
        pr = jax.nn.softmax(sc, axis=-1)
        ctx = jnp.einsum('bhqk,bkhd->bqhd', pr.astype(cdt), vh.astype(cdt),
                         preferred_element_type=jnp.float32).reshape(B, S, D)
        attn = mm(ctx, p['wo'].T) + p['bo']
        x1 = ln(x + attn, p['ln1w'], p['ln1b'])
        h = jax.nn.relu(mm(x1, p['w1'].T) + p['b1'])
        ff = mm(h, p['w2'].T) + p['b2']
        x = ln(x1 + ff, p['ln2w'], p['ln2b'])
    return x


if __name__ == "__main__":
    B, S = 2, 8
    key = jax.random.PRNGKey(0)
    kx, kh_key, kp = jax.random.split(key, 3)

    x = jax.random.normal(kx, (B, S, D_MODEL), jnp.float32)
    kh_keys = jax.random.split(kh_key, N_LAYERS)
    knowledge_attn_heads = [jax.random.normal(k, (B, S, D_MODEL), jnp.float32)
                            for k in kh_keys]

    param_keys = jax.random.split(kp, N_LAYERS)
    layer_params = [init_layer_params(k) for k in param_keys]

    out = knowledge_attention_encoder_forward(x, knowledge_attn_heads, layer_params)
    out = jax.block_until_ready(out)

    assert out.shape == (B, S, D_MODEL)
    assert jnp.all(jnp.isfinite(out))

    # Tight check: precision-matched reference (bf16 matmul operands, f32 accumulation,
    # f32 softmax/LayerNorm) -- catches logic bugs without being masked by bf16 error.
    ref_matched = _reference_forward(x, knowledge_attn_heads, layer_params,
                                     matmul_dtype=jnp.bfloat16)
    err_tight = float(jnp.max(jnp.abs(out - ref_matched)))
    assert err_tight < 5e-3, f"mismatch vs matched-precision reference: {err_tight}"

    # Sanity check: relative deviation from the full-f32 reference stays small.
    ref_f32 = _reference_forward(x, knowledge_attn_heads, layer_params,
                                 matmul_dtype=jnp.float32)
    rel = float(jnp.linalg.norm(out - ref_f32) / jnp.linalg.norm(ref_f32))
    assert rel < 1e-1, f"bf16 relative deviation vs f32 reference too large: {rel}"

    print("KERNEL_OK")
</pallas_src>

<mosaic_0001>
module attributes {stable_mosaic.version = 11 : i64} {
  func.func @fused_knowledge_encoder_kernel(%arg0: i32, %arg1: i32, %arg2: memref<1x8x128xf32, #tpu.memory_space<vmem>>, %arg3: memref<1x1x8x128xf32, #tpu.memory_space<vmem>>, %arg4: memref<4x128x128xbf16, #tpu.memory_space<vmem>>, %arg5: memref<4x128x256xbf16, #tpu.memory_space<vmem>>, %arg6: memref<4x128x128xbf16, #tpu.memory_space<vmem>>, %arg7: memref<4x128x256xbf16, #tpu.memory_space<vmem>>, %arg8: memref<4x256x128xbf16, #tpu.memory_space<vmem>>, %arg9: memref<4x8x128xf32, #tpu.memory_space<vmem>>, %arg10: memref<4x1x256xf32, #tpu.memory_space<vmem>>, %arg11: memref<4x1x256xf32, #tpu.memory_space<vmem>>, %arg12: memref<1x8x128xf32, #tpu.memory_space<vmem>>) attributes {dimension_semantics = [#tpu.dimension_semantics<parallel>, #tpu.dimension_semantics<arbitrary>], iteration_bounds = array<i64: 2, 4>, scalar_prefetch = 0 : i64, scratch_operands = 0 : i64, tpu.core_type = #tpu.core_type<tc>, window_params = [{transform_indices = @transform_0, window_bounds = array<i64: 1, 8, 128>}, {transform_indices = @transform_1, window_bounds = array<i64: 1, 1, 8, 128>}, {pipeline_mode = #tpu.pipeline_mode<synchronous>, transform_indices = @transform_2, window_bounds = array<i64: 4, 128, 128>}, {pipeline_mode = #tpu.pipeline_mode<synchronous>, transform_indices = @transform_3, window_bounds = array<i64: 4, 128, 256>}, {pipeline_mode = #tpu.pipeline_mode<synchronous>, transform_indices = @transform_4, window_bounds = array<i64: 4, 128, 128>}, {pipeline_mode = #tpu.pipeline_mode<synchronous>, transform_indices = @transform_5, window_bounds = array<i64: 4, 128, 256>}, {pipeline_mode = #tpu.pipeline_mode<synchronous>, transform_indices = @transform_6, window_bounds = array<i64: 4, 256, 128>}, {pipeline_mode = #tpu.pipeline_mode<synchronous>, transform_indices = @transform_7, window_bounds = array<i64: 4, 8, 128>}, {pipeline_mode = #tpu.pipeline_mode<synchronous>, transform_indices = @transform_8, window_bounds = array<i64: 4, 1, 256>}, {pipeline_mode = #tpu.pipeline_mode<synchronous>, transform_indices = @transform_9, window_bounds = array<i64: 4, 1, 256>}, {transform_indices = @transform_10, window_bounds = array<i64: 1, 8, 128>}]} {
    %c0_i32 = arith.constant 0 : i32
    %0 = arith.cmpi eq, %arg1, %c0_i32 : i32
    %1 = arith.extui %0 : i1 to i32
    %c0_i32_0 = arith.constant 0 : i32
    %2 = arith.cmpi ne, %1, %c0_i32_0 : i32
    scf.if %2 {
      %c0_46 = arith.constant 0 : index
      %c0_47 = arith.constant 0 : index
      %c0_48 = arith.constant 0 : index
      %153 = vector.load %arg2[%c0_46, %c0_47, %c0_48] : memref<1x8x128xf32, #tpu.memory_space<vmem>>, vector<1x8x128xf32>
      %c0_49 = arith.constant 0 : index
      %c0_50 = arith.constant 0 : index
      %c0_51 = arith.constant 0 : index
      %154 = vector.load %arg12[%c0_49, %c0_50, %c0_51] : memref<1x8x128xf32, #tpu.memory_space<vmem>>, vector<1x8x128xf32>
      tpu.vector_store %arg12[%c0_49, %c0_50, %c0_51], %153 {strides = array<i32>} : memref<1x8x128xf32, #tpu.memory_space<vmem>>, vector<1x8x128xf32>,
    } else {
    }
    %c0 = arith.constant 0 : index
    %c0_1 = arith.constant 0 : index
    %c0_2 = arith.constant 0 : index
    %3 = vector.load %arg12[%c0, %c0_1, %c0_2] : memref<1x8x128xf32, #tpu.memory_space<vmem>>, vector<1x8x128xf32>
    %4 = vector.shape_cast %3 : vector<1x8x128xf32> to vector<8x128xf32>
    %c0_3 = arith.constant 0 : index
    %c0_4 = arith.constant 0 : index
    %c0_5 = arith.constant 0 : index
    %c0_6 = arith.constant 0 : index
    %5 = vector.load %arg3[%c0_3, %c0_4, %c0_5, %c0_6] : memref<1x1x8x128xf32, #tpu.memory_space<vmem>>, vector<1x1x8x128xf32>
    %6 = vector.shape_cast %5 : vector<1x1x8x128xf32> to vector<1x8x128xf32>
    %7 = vector.shape_cast %6 : vector<1x8x128xf32> to vector<8x128xf32>
    %8 = arith.index_cast %arg1 : i32 to index
    %c0_7 = arith.constant 0 : index
    %c0_8 = arith.constant 0 : index
    %9 = vector.load %arg4[%8, %c0_7, %c0_8] : memref<4x128x128xbf16, #tpu.memory_space<vmem>>, vector<1x128x128xbf16>
    %10 = vector.shape_cast %9 : vector<1x128x128xbf16> to vector<128x128xbf16>
    %11 = arith.index_cast %arg1 : i32 to index
    %c0_9 = arith.constant 0 : index
    %c0_10 = arith.constant 0 : index
    %12 = vector.load %arg5[%11, %c0_9, %c0_10] : memref<4x128x256xbf16, #tpu.memory_space<vmem>>, vector<1x128x256xbf16>
    %13 = vector.shape_cast %12 : vector<1x128x256xbf16> to vector<128x256xbf16>
    %14 = arith.index_cast %arg1 : i32 to index
    %c0_11 = arith.constant 0 : index
    %c0_12 = arith.constant 0 : index
    %15 = vector.load %arg6[%14, %c0_11, %c0_12] : memref<4x128x128xbf16, #tpu.memory_space<vmem>>, vector<1x128x128xbf16>
    %16 = vector.shape_cast %15 : vector<1x128x128xbf16> to vector<128x128xbf16>
    %17 = arith.index_cast %arg1 : i32 to index
    %c0_13 = arith.constant 0 : index
    %c0_14 = arith.constant 0 : index
    %18 = vector.load %arg7[%17, %c0_13, %c0_14] : memref<4x128x256xbf16, #tpu.memory_space<vmem>>, vector<1x128x256xbf16>
    %19 = vector.shape_cast %18 : vector<1x128x256xbf16> to vector<128x256xbf16>
    %20 = arith.index_cast %arg1 : i32 to index
    %c0_15 = arith.constant 0 : index
    %c0_16 = arith.constant 0 : index
    %21 = vector.load %arg8[%20, %c0_15, %c0_16] : memref<4x256x128xbf16, #tpu.memory_space<vmem>>, vector<1x256x128xbf16>
    %22 = vector.shape_cast %21 : vector<1x256x128xbf16> to vector<256x128xbf16>
    %23 = arith.index_cast %arg1 : i32 to index
    %c0_17 = arith.constant 0 : index
    %c0_18 = arith.constant 0 : index
    %24 = vector.load %arg9[%23, %c0_17, %c0_18] : memref<4x8x128xf32, #tpu.memory_space<vmem>>, vector<1x8x128xf32>
    %25 = vector.shape_cast %24 : vector<1x8x128xf32> to vector<8x128xf32>
    %26 = vector.extract_strided_slice %25 {offsets = [0, 0], sizes = [1, 128], strides = [1, 1]} : vector<8x128xf32> to vector<1x128xf32>
    %27 = vector.extract_strided_slice %25 {offsets = [1, 0], sizes = [1, 128], strides = [1, 1]} : vector<8x128xf32> to vector<1x128xf32>
    %28 = vector.extract_strided_slice %25 {offsets = [2, 0], sizes = [1, 128], strides = [1, 1]} : vector<8x128xf32> to vector<1x128xf32>
    %29 = vector.extract_strided_slice %25 {offsets = [3, 0], sizes = [1, 128], strides = [1, 1]} : vector<8x128xf32> to vector<1x128xf32>
    %30 = vector.extract_strided_slice %25 {offsets = [4, 0], sizes = [1, 128], strides = [1, 1]} : vector<8x128xf32> to vector<1x128xf32>
    %31 = vector.extract_strided_slice %25 {offsets = [5, 0], sizes = [1, 128], strides = [1, 1]} : vector<8x128xf32> to vector<1x128xf32>
    %32 = vector.extract_strided_slice %25 {offsets = [6, 0], sizes = [1, 128], strides = [1, 1]} : vector<8x128xf32> to vector<1x128xf32>
    %33 = arith.index_cast %arg1 : i32 to index
    %c0_19 = arith.constant 0 : index
    %c0_20 = arith.constant 0 : index
    %34 = vector.load %arg10[%33, %c0_19, %c0_20] : memref<4x1x256xf32, #tpu.memory_space<vmem>>, vector<1x1x256xf32>
    %35 = vector.shape_cast %34 : vector<1x1x256xf32> to vector<1x256xf32>
    %36 = arith.index_cast %arg1 : i32 to index
    %c0_21 = arith.constant 0 : index
    %c0_22 = arith.constant 0 : index
    %37 = vector.load %arg11[%36, %c0_21, %c0_22] : memref<4x1x256xf32, #tpu.memory_space<vmem>>, vector<1x1x256xf32>
    %38 = vector.shape_cast %37 : vector<1x1x256xf32> to vector<1x256xf32>
    %39 = arith.truncf %4 : vector<8x128xf32> to vector<8x128xbf16>
    %cst = arith.constant dense<0.000000e+00> : vector<8x128xf32>
    %40 = tpu.matmul %39, %10, %cst {dimension_numbers = #tpu.dot_dimension_numbers<[1], [0], [0], [1], [0, 0, 1, 1], [], []>} : vector<8x128xbf16>, vector<128x128xbf16>, vector<8x128xf32> -> vector<8x128xf32>
    %41 = vector.broadcast %26 : vector<1x128xf32> to vector<8x128xf32>
    %42 = arith.addf %40, %41 : vector<8x128xf32>
    %43 = arith.truncf %7 : vector<8x128xf32> to vector<8x128xbf16>
    %cst_23 = arith.constant dense<0.000000e+00> : vector<8x256xf32>
    %44 = tpu.matmul %43, %13, %cst_23 {dimension_numbers = #tpu.dot_dimension_numbers<[1], [0], [0], [1], [0, 0, 1, 1], [], []>} : vector<8x128xbf16>, vector<128x256xbf16>, vector<8x256xf32> -> vector<8x256xf32>
    %45 = vector.broadcast %35 : vector<1x256xf32> to vector<8x256xf32>
    %46 = arith.addf %44, %45 : vector<8x256xf32>
    %47 = vector.extract_strided_slice %46 {offsets = [0, 0], sizes = [8, 128], strides = [1, 1]} : vector<8x256xf32> to vector<8x128xf32>
    %48 = vector.extract_strided_slice %46 {offsets = [0, 128], sizes = [8, 128], strides = [1, 1]} : vector<8x256xf32> to vector<8x128xf32>
    %cst_24 = arith.constant 0.176776692 : f32
    %49 = vector.broadcast %cst_24 : f32 to vector<8x128xf32>
    %50 = arith.mulf %42, %49 : vector<8x128xf32>
    %51 = vector.shape_cast %50 : vector<8x128xf32> to vector<1x8x128xf32>
    %52 = vector.shape_cast %47 : vector<8x128xf32> to vector<1x8x128xf32>
    %53 = vector.shape_cast %48 : vector<8x128xf32> to vector<1x8x128xf32>
    %54 = vector.extract_strided_slice %51 {offsets = [0, 0, 0], sizes = [1, 8, 32], strides = [1, 1, 1]} : vector<1x8x128xf32> to vector<1x8x32xf32>
    %55 = vector.extract_strided_slice %51 {offsets = [0, 0, 32], sizes = [1, 8, 32], strides = [1, 1, 1]} : vector<1x8x128xf32> to vector<1x8x32xf32>
    %56 = vector.extract_strided_slice %51 {offsets = [0, 0, 64], sizes = [1, 8, 32], strides = [1, 1, 1]} : vector<1x8x128xf32> to vector<1x8x32xf32>
    %57 = vector.extract_strided_slice %51 {offsets = [0, 0, 96], sizes = [1, 8, 32], strides = [1, 1, 1]} : vector<1x8x128xf32> to vector<1x8x32xf32>
    %58 = tpu.concatenate %54, %55, %56, %57 in 0 : vector<1x8x32xf32>, vector<1x8x32xf32>, vector<1x8x32xf32>, vector<1x8x32xf32> -> vector<4x8x32xf32>
    %59 = arith.truncf %58 : vector<4x8x32xf32> to vector<4x8x32xbf16>
    %60 = vector.extract_strided_slice %52 {offsets = [0, 0, 0], sizes = [1, 8, 32], strides = [1, 1, 1]} : vector<1x8x128xf32> to vector<1x8x32xf32>
    %61 = vector.extract_strided_slice %52 {offsets = [0, 0, 32], sizes = [1, 8, 32], strides = [1, 1, 1]} : vector<1x8x128xf32> to vector<1x8x32xf32>
    %62 = vector.extract_strided_slice %52 {offsets = [0, 0, 64], sizes = [1, 8, 32], strides = [1, 1, 1]} : vector<1x8x128xf32> to vector<1x8x32xf32>
    %63 = vector.extract_strided_slice %52 {offsets = [0, 0, 96], sizes = [1, 8, 32], strides = [1, 1, 1]} : vector<1x8x128xf32> to vector<1x8x32xf32>
    %64 = tpu.concatenate %60, %61, %62, %63 in 0 : vector<1x8x32xf32>, vector<1x8x32xf32>, vector<1x8x32xf32>, vector<1x8x32xf32> -> vector<4x8x32xf32>
    %65 = arith.truncf %64 : vector<4x8x32xf32> to vector<4x8x32xbf16>
    %66 = vector.extract_strided_slice %53 {offsets = [0, 0, 0], sizes = [1, 8, 32], strides = [1, 1, 1]} : vector<1x8x128xf32> to vector<1x8x32xf32>
    %67 = vector.extract_strided_slice %53 {offsets = [0, 0, 32], sizes = [1, 8, 32], strides = [1, 1, 1]} : vector<1x8x128xf32> to vector<1x8x32xf32>
    %68 = vector.extract_strided_slice %53 {offsets = [0, 0, 64], sizes = [1, 8, 32], strides = [1, 1, 1]} : vector<1x8x128xf32> to vector<1x8x32xf32>
    %69 = vector.extract_strided_slice %53 {offsets = [0, 0, 96], sizes = [1, 8, 32], strides = [1, 1, 1]} : vector<1x8x128xf32> to vector<1x8x32xf32>
    %70 = tpu.concatenate %66, %67, %68, %69 in 0 : vector<1x8x32xf32>, vector<1x8x32xf32>, vector<1x8x32xf32>, vector<1x8x32xf32> -> vector<4x8x32xf32>
    %71 = arith.truncf %70 : vector<4x8x32xf32> to vector<4x8x32xbf16>
    "tpu.trace_start"() <{level = 10 : i32, message = "nqd,nkd->nqk"}> : () -> ()
    %cst_25 = arith.constant dense<0.000000e+00> : vector<4x8x8xf32>
    %72 = tpu.matmul %59, %65, %cst_25 {dimension_numbers = #tpu.dot_dimension_numbers<[2], [2], [1], [1], [0, 0, 0, 1, 1, 1], [0], [0]>} : vector<4x8x32xbf16>, vector<4x8x32xbf16>, vector<4x8x8xf32> -> vector<4x8x8xf32>
    "tpu.trace_stop"() : () -> ()
    %cst_26 = arith.constant dense<0xFF800000> : vector<4x8xf32>
    %73 = vector.multi_reduction <maximumf>, %72, %cst_26 [2] : vector<4x8x8xf32> to vector<4x8xf32>
    %74 = vector.shape_cast %73 : vector<4x8xf32> to vector<4x8x1xf32>
    %75 = vector.broadcast %74 : vector<4x8x1xf32> to vector<4x8x8xf32>
    %76 = arith.subf %72, %75 : vector<4x8x8xf32>
    %77 = math.exp %76 : vector<4x8x8xf32>
    %cst_27 = arith.constant dense<0.000000e+00> : vector<4x8xf32>
    %78 = vector.multi_reduction <add>, %77, %cst_27 [2] : vector<4x8x8xf32> to vector<4x8xf32>
    %79 = vector.shape_cast %78 : vector<4x8xf32> to vector<4x8x1xf32>
    %80 = tpu.reciprocal %79 : vector<4x8x1xf32> -> vector<4x8x1xf32>
    %81 = vector.broadcast %80 : vector<4x8x1xf32> to vector<4x8x8xf32>
    %82 = arith.mulf %77, %81 : vector<4x8x8xf32>
    %83 = arith.truncf %82 : vector<4x8x8xf32> to vector<4x8x8xbf16>
    "tpu.trace_start"() <{level = 10 : i32, message = "nqk,nkd->nqd"}> : () -> ()
    %cst_28 = arith.constant dense<0.000000e+00> : vector<4x8x32xf32>
    %84 = tpu.matmul %83, %71, %cst_28 {dimension_numbers = #tpu.dot_dimension_numbers<[2], [1], [1], [2], [0, 0, 0, 1, 1, 2], [0], [0]>} : vector<4x8x8xbf16>, vector<4x8x32xbf16>, vector<4x8x32xf32> -> vector<4x8x32xf32>
    "tpu.trace_stop"() : () -> ()
    %85 = vector.extract_strided_slice %84 {offsets = [0, 0, 0], sizes = [1, 8, 32], strides = [1, 1, 1]} : vector<4x8x32xf32> to vector<1x8x32xf32>
    %86 = vector.extract_strided_slice %84 {offsets = [1, 0, 0], sizes = [1, 8, 32], strides = [1, 1, 1]} : vector<4x8x32xf32> to vector<1x8x32xf32>
    %87 = vector.extract_strided_slice %84 {offsets = [2, 0, 0], sizes = [1, 8, 32], strides = [1, 1, 1]} : vector<4x8x32xf32> to vector<1x8x32xf32>
    %88 = vector.extract_strided_slice %84 {offsets = [3, 0, 0], sizes = [1, 8, 32], strides = [1, 1, 1]} : vector<4x8x32xf32> to vector<1x8x32xf32>
    %89 = tpu.concatenate %85, %86, %87, %88 in 2 : vector<1x8x32xf32>, vector<1x8x32xf32>, vector<1x8x32xf32>, vector<1x8x32xf32> -> vector<1x8x128xf32>
    %90 = vector.shape_cast %89 : vector<1x8x128xf32> to vector<8x128xf32>
    %91 = arith.truncf %90 : vector<8x128xf32> to vector<8x128xbf16>
    %cst_29 = arith.constant dense<0.000000e+00> : vector<8x128xf32>
    %92 = tpu.matmul %91, %16, %cst_29 {dimension_numbers = #tpu.dot_dimension_numbers<[1], [0], [0], [1], [0, 0, 1, 1], [], []>} : vector<8x128xbf16>, vector<128x128xbf16>, vector<8x128xf32> -> vector<8x128xf32>
    %93 = vector.broadcast %27 : vector<1x128xf32> to vector<8x128xf32>
    %94 = arith.addf %92, %93 : vector<8x128xf32>
    %95 = arith.addf %4, %94 : vector<8x128xf32>
    %cst_30 = arith.constant dense<0.000000e+00> : vector<8xf32>
    %96 = vector.multi_reduction <add>, %95, %cst_30 [1] : vector<8x128xf32> to vector<8xf32>
    %97 = vector.shape_cast %96 : vector<8xf32> to vector<8x1xf32>
    %cst_31 = arith.constant 1.280000e+02 : f32
    %98 = vector.broadcast %cst_31 : f32 to vector<8x1xf32>
    %99 = arith.divf %97, %98 : vector<8x1xf32>
    %100 = vector.broadcast %99 : vector<8x1xf32> to vector<8x128xf32>
    %101 = arith.subf %95, %100 : vector<8x128xf32>
    %102 = arith.mulf %101, %101 : vector<8x128xf32>
    %cst_32 = arith.constant dense<0.000000e+00> : vector<8xf32>
    %103 = vector.multi_reduction <add>, %102, %cst_32 [1] : vector<8x128xf32> to vector<8xf32>
    %104 = vector.shape_cast %103 : vector<8xf32> to vector<8x1xf32>
    %cst_33 = arith.constant 1.280000e+02 : f32
    %105 = vector.broadcast %cst_33 : f32 to vector<8x1xf32>
    %106 = arith.divf %104, %105 : vector<8x1xf32>
    %107 = vector.broadcast %99 : vector<8x1xf32> to vector<8x128xf32>
    %108 = arith.subf %95, %107 : vector<8x128xf32>
    %cst_34 = arith.constant 9.99999974E-6 : f32
    %109 = vector.broadcast %cst_34 : f32 to vector<8x1xf32>
    %110 = arith.addf %106, %109 : vector<8x1xf32>
    %111 = math.rsqrt %110 : vector<8x1xf32>
    %112 = vector.broadcast %111 : vector<8x1xf32> to vector<8x128xf32>
    %113 = arith.mulf %108, %112 : vector<8x128xf32>
    %114 = vector.broadcast %28 : vector<1x128xf32> to vector<8x128xf32>
    %115 = arith.mulf %113, %114 : vector<8x128xf32>
    %116 = vector.broadcast %29 : vector<1x128xf32> to vector<8x128xf32>
    %117 = arith.addf %115, %116 : vector<8x128xf32>
    %118 = arith.truncf %117 : vector<8x128xf32> to vector<8x128xbf16>
    %cst_35 = arith.constant dense<0.000000e+00> : vector<8x256xf32>
    %119 = tpu.matmul %118, %19, %cst_35 {dimension_numbers = #tpu.dot_dimension_numbers<[1], [0], [0], [1], [0, 0, 1, 1], [], []>} : vector<8x128xbf16>, vector<128x256xbf16>, vector<8x256xf32> -> vector<8x256xf32>
    %120 = vector.broadcast %38 : vector<1x256xf32> to vector<8x256xf32>
    %121 = arith.addf %119, %120 : vector<8x256xf32>
    %cst_36 = arith.constant 0.000000e+00 : f32
    %122 = vector.broadcast %cst_36 : f32 to vector<8x256xf32>
    %123 = arith.maximumf %121, %122 : vector<8x256xf32>
    %124 = arith.truncf %123 : vector<8x256xf32> to vector<8x256xbf16>
    %cst_37 = arith.constant dense<0.000000e+00> : vector<8x128xf32>
    %125 = tpu.matmul %124, %22, %cst_37 {dimension_numbers = #tpu.dot_dimension_numbers<[1], [0], [0], [1], [0, 0, 1, 1], [], []>} : vector<8x256xbf16>, vector<256x128xbf16>, vector<8x128xf32> -> vector<8x128xf32>
    %126 = vector.broadcast %32 : vector<1x128xf32> to vector<8x128xf32>
    %127 = arith.addf %125, %126 : vector<8x128xf32>
    %128 = arith.addf %117, %127 : vector<8x128xf32>
    %cst_38 = arith.constant dense<0.000000e+00> : vector<8xf32>
    %129 = vector.multi_reduction <add>, %128, %cst_38 [1] : vector<8x128xf32> to vector<8xf32>
    %130 = vector.shape_cast %129 : vector<8xf32> to vector<8x1xf32>
    %cst_39 = arith.constant 1.280000e+02 : f32
    %131 = vector.broadcast %cst_39 : f32 to vector<8x1xf32>
    %132 = arith.divf %130, %131 : vector<8x1xf32>
    %133 = vector.broadcast %132 : vector<8x1xf32> to vector<8x128xf32>
    %134 = arith.subf %128, %133 : vector<8x128xf32>
    %135 = arith.mulf %134, %134 : vector<8x128xf32>
    %cst_40 = arith.constant dense<0.000000e+00> : vector<8xf32>
    %136 = vector.multi_reduction <add>, %135, %cst_40 [1] : vector<8x128xf32> to vector<8xf32>
    %137 = vector.shape_cast %136 : vector<8xf32> to vector<8x1xf32>
    %cst_41 = arith.constant 1.280000e+02 : f32
    %138 = vector.broadcast %cst_41 : f32 to vector<8x1xf32>
    %139 = arith.divf %137, %138 : vector<8x1xf32>
    %140 = vector.broadcast %132 : vector<8x1xf32> to vector<8x128xf32>
    %141 = arith.subf %128, %140 : vector<8x128xf32>
    %cst_42 = arith.constant 9.99999974E-6 : f32
    %142 = vector.broadcast %cst_42 : f32 to vector<8x1xf32>
    %143 = arith.addf %139, %142 : vector<8x1xf32>
    %144 = math.rsqrt %143 : vector<8x1xf32>
    %145 = vector.broadcast %144 : vector<8x1xf32> to vector<8x128xf32>
    %146 = arith.mulf %141, %145 : vector<8x128xf32>
    %147 = vector.broadcast %30 : vector<1x128xf32> to vector<8x128xf32>
    %148 = arith.mulf %146, %147 : vector<8x128xf32>
    %149 = vector.broadcast %31 : vector<1x128xf32> to vector<8x128xf32>
    %150 = arith.addf %148, %149 : vector<8x128xf32>
    %151 = vector.shape_cast %150 : vector<8x128xf32> to vector<1x8x128xf32>
    %c0_43 = arith.constant 0 : index
    %c0_44 = arith.constant 0 : index
    %c0_45 = arith.constant 0 : index
    %152 = vector.load %arg12[%c0_43, %c0_44, %c0_45] : memref<1x8x128xf32, #tpu.memory_space<vmem>>, vector<1x8x128xf32>
    tpu.vector_store %arg12[%c0_43, %c0_44, %c0_45], %151 {strides = array<i32>} : memref<1x8x128xf32, #tpu.memory_space<vmem>>, vector<1x8x128xf32>,
    return
  }
  func.func @transform_0(%arg0: i32, %arg1: i32) -> (i32, i32, i32) {
    %c0_i32 = arith.constant 0 : i32
    %c0_i32_0 = arith.constant 0 : i32
    %c0_i32_1 = arith.constant 0 : i32
    return %arg0, %c0_i32, %c0_i32_0 : i32, i32, i32
  }
  func.func @transform_1(%arg0: i32, %arg1: i32) -> (i32, i32, i32, i32) {
    %c0_i32 = arith.constant 0 : i32
    %c0_i32_0 = arith.constant 0 : i32
    %c0_i32_1 = arith.constant 0 : i32
    return %arg1, %arg0, %c0_i32, %c0_i32_0 : i32, i32, i32, i32
  }
  func.func @transform_2(%arg0: i32, %arg1: i32) -> (i32, i32, i32) {
    %c0_i32 = arith.constant 0 : i32
    %c0_i32_0 = arith.constant 0 : i32
    %c0_i32_1 = arith.constant 0 : i32
    %c0_i32_2 = arith.constant 0 : i32
    return %c0_i32, %c0_i32_0, %c0_i32_1 : i32, i32, i32
  }
  func.func @transform_3(%arg0: i32, %arg1: i32) -> (i32, i32, i32) {
    %c0_i32 = arith.constant 0 : i32
    %c0_i32_0 = arith.constant 0 : i32
    %c0_i32_1 = arith.constant 0 : i32
    %c0_i32_2 = arith.constant 0 : i32
    return %c0_i32, %c0_i32_0, %c0_i32_1 : i32, i32, i32
  }
  func.func @transform_4(%arg0: i32, %arg1: i32) -> (i32, i32, i32) {
    %c0_i32 = arith.constant 0 : i32
    %c0_i32_0 = arith.constant 0 : i32
    %c0_i32_1 = arith.constant 0 : i32
    %c0_i32_2 = arith.constant 0 : i32
    return %c0_i32, %c0_i32_0, %c0_i32_1 : i32, i32, i32
  }
  func.func @transform_5(%arg0: i32, %arg1: i32) -> (i32, i32, i32) {
    %c0_i32 = arith.constant 0 : i32
    %c0_i32_0 = arith.constant 0 : i32
    %c0_i32_1 = arith.constant 0 : i32
    %c0_i32_2 = arith.constant 0 : i32
    return %c0_i32, %c0_i32_0, %c0_i32_1 : i32, i32, i32
  }
  func.func @transform_6(%arg0: i32, %arg1: i32) -> (i32, i32, i32) {
    %c0_i32 = arith.constant 0 : i32
    %c0_i32_0 = arith.constant 0 : i32
    %c0_i32_1 = arith.constant 0 : i32
    %c0_i32_2 = arith.constant 0 : i32
    return %c0_i32, %c0_i32_0, %c0_i32_1 : i32, i32, i32
  }
  func.func @transform_7(%arg0: i32, %arg1: i32) -> (i32, i32, i32) {
    %c0_i32 = arith.constant 0 : i32
    %c0_i32_0 = arith.constant 0 : i32
    %c0_i32_1 = arith.constant 0 : i32
    %c0_i32_2 = arith.constant 0 : i32
    return %c0_i32, %c0_i32_0, %c0_i32_1 : i32, i32, i32
  }
  func.func @transform_8(%arg0: i32, %arg1: i32) -> (i32, i32, i32) {
    %c0_i32 = arith.constant 0 : i32
    %c0_i32_0 = arith.constant 0 : i32
    %c0_i32_1 = arith.constant 0 : i32
    %c0_i32_2 = arith.constant 0 : i32
    return %c0_i32, %c0_i32_0, %c0_i32_1 : i32, i32, i32
  }
  func.func @transform_9(%arg0: i32, %arg1: i32) -> (i32, i32, i32) {
    %c0_i32 = arith.constant 0 : i32
    %c0_i32_0 = arith.constant 0 : i32
    %c0_i32_1 = arith.constant 0 : i32
    %c0_i32_2 = arith.constant 0 : i32
    return %c0_i32, %c0_i32_0, %c0_i32_1 : i32, i32, i32
  }
  func.func @transform_10(%arg0: i32, %arg1: i32) -> (i32, i32, i32) {
    %c0_i32 = arith.constant 0 : i32
    %c0_i32_0 = arith.constant 0 : i32
    %c0_i32_1 = arith.constant 0 : i32
    return %arg0, %c0_i32, %c0_i32_0 : i32, i32, i32
  }
}

</mosaic_0001>

<bundles_post_ra>
// kernel: tpu_custom_call.1
= control target key start
LH: loop header
LB: loop body
LE: loop exit
PB: predicated region body
PF: predicated region fallthrough
CT: control target
= control target key end

     0   :  { %s3643_s0 = inlined_call_operand.hbm [shape: f32[2,8,128], index: 0, kind: input, shape index: {}]   ;;  %s3644_s1 = inlined_call_operand.hbm [shape: f32[4,2,8,128], index: 1, kind: input, shape index: {}]   ;;  %s3645_s2 = inlined_call_operand.hbm [shape: bf16[4,128,128], index: 2, kind: input, shape index: {}]   ;;  %s3646_s3 = inlined_call_operand.hbm [shape: bf16[4,128,256], index: 3, kind: input, shape index: {}]   ;;  %s3647_s4 = inlined_call_operand.hbm [shape: bf16[4,128,128], index: 4, kind: input, shape index: {}]   ;;  %s3648_s5 = inlined_call_operand.hbm [shape: bf16[4,128,256], index: 5, kind: input, shape index: {}]   ;;  %s3649_s6 = inlined_call_operand.hbm [shape: bf16[4,256,128], index: 6, kind: input, shape index: {}]   ;;  %s3650_s7 = inlined_call_operand.hbm [shape: f32[4,8,128], index: 7, kind: input, shape index: {}]   ;;  %s3651_s8 = inlined_call_operand.vmem [shape: f32[4,1,256], index: 8, kind: input, shape index: {}]   ;;  %s3652_s9 = inlined_call_operand.vmem [shape: f32[4,1,256], index: 9, kind: input, shape index: {}]   ;;  %s3653_s10 = inlined_call_operand.hbm [shape: f32[2,8,128], index: 10, kind: output, shape index: {}]  }
   0x1   :  { %3675 = sst [smem:[#allocation32_spill]] %s3643_s0 }
   0x2   :  { %3676 = sst [smem:[#allocation33_spill]] %s3644_s1 }
   0x3   :  { %3677 = sst [smem:[#allocation34_spill]] %s3645_s2 }
   0x4   :  { %3678 = sst [smem:[#allocation35_spill]] %s3646_s3 }
   0x5   :  { %3679 = sst [smem:[#allocation36_spill]] %s3647_s4 }
   0x6   :  { %3680 = sst [smem:[#allocation37_spill]] %s3648_s5 }
   0x7   :  { %3681 = sst [smem:[#allocation38_spill]] %s3649_s6 }
   0x8   :  { %3682 = sst [smem:[#allocation39_spill]] %s3650_s7 }
   0x9   :  { %3683 = sst [smem:[#allocation40_spill]] %s3651_s8 }
   0xa   :  { %3684 = sst [smem:[#allocation41_spill]] %s3652_s9 }
   0xb   :  { %3685 = sst [smem:[#allocation42_spill]] %s3653_s10 }
   0xc   :  { %15 = vsyncpa [#allocation3], 0 }
   0xd   :  { %17 = vsyncpa [#allocation3 + $0x1], 0 }
   0xe   :  { %18 = vsyncpa [#allocation6], 0 }
   0xf   :  { %20 = vsyncpa [#allocation6 + $0x1], 0 }
  0x10   :  { %21 = vsyncpa [#allocation9], 0 }
  0x11   :  { %22 = vsyncpa [#allocation12], 0 }
  0x12   :  { %23 = vsyncpa [#allocation15], 0 }
  0x13   :  { %24 = vsyncpa [#allocation4], 0 }
  0x14   :  { %26 = vsyncpa [#allocation4 + $0x1], 0  ;;  %s2938_s13 = smov 0   ;;  %s2940_s14 = smov 0  }
  0x15   :  { %s2942_s15 = smov 0   ;;  %s2944_s16 = smov 0  }
  0x16   :  { %s2946_s17 = smov 0   ;;  %s2948_s18 = smov 0  }
  0x17   :  { %s2950_s19 = smov 0   ;;  %s2952_s20 = smov 0  }
  0x18   :  { %s2954_s21 = smov 0   ;;  %s2956_s22 = smov 0  }
  0x19   :  { %s2958_s23 = smov 0  }
  0x1a LB: > { %3686 = sst [smem:[#allocation24_spill]] %s2822_s13  ;;  %s2994_s24 = sadd.s32 4294967295, %s2862_s23   ;;  %s2862_s23 = sphi %s2958_s23, %s32_s23   ;;  %s2858_s22 = sphi %s2956_s22, %s3754_s22   ;;  %s2854_s21 = sphi %s2954_s21, %s3753_s21   ;;  %s2850_s20 = sphi %s2952_s20, %s3752_s20   ;;  %s2846_s19 = sphi %s2950_s19, %s3751_s19   ;;  %s2842_s18 = sphi %s2948_s18, %s3750_s18   ;;  %s2838_s17 = sphi %s2946_s17, %s3749_s17   ;;  %s2834_s16 = sphi %s2944_s16, %s3748_s16   ;;  %s2830_s15 = sphi %s2942_s15, %s3747_s15   ;;  %s2826_s14 = sphi %s2940_s14, %s3746_s14   ;;  %s2822_s13 = sphi %s2938_s13, %s3745_s13  }
  0x1b   : > { %3687 = sst [smem:[#allocation25_spill]] %s2834_s16  ;;  %p1956_p0 = scmp.ge.s32.totalorder %s2862_s23, 1 }
  0x1c   : > { %3688 = sst [smem:[#allocation26_spill]] %s2846_s19  ;;  %p3655_p1 = scmp.eq.s32.totalorder %s2994_s24, 0 }
  0x1d   : > { %3689 = sst [smem:[#allocation27_spill]] %s2850_s20  ;;  %p297_p2 = scmp.lt.s32.totalorder %s2862_s23, 9 }
  0x1e   : > { %s2864_s26 = smov [#allocation7]   ;;  %s2865_s29 = smov [#allocation8]  }
  0x1f   : > { %p2999_p3 = pnand %p1956_p0, %p297_p2  ;;  %s309_s27 = sshll.u32 %s2864_s26, 4  ;;  %s310_s27 = int_to_ptr.vmem [resolvable:$true] %s309_s27 }
  0x20   : > { %s322_s30 = sshll.u32 %s2865_s29, 4  ;;  %s3693_s2 = sld [smem:[#allocation34_spill]]  ;;  %s3011_s30 = int_to_ptr.vmem [resolvable:$true] %s322_s30 }
  0x21   : > { %s3690_s25 = scalar_select %p2999_p3, 1, 0 }
  0x22   : > { %p2244_p4 = pneg %p2999_p3 }
  0x23   : > { %3691 = sst [smem:[#allocation28_spill]] %s3690_s25 }
  0x24   : > { %p3007_p5 = pnand %p2244_p4, %p3655_p1 }
  0x26   : > { %s2492_s10 = scalar_lea.hbm %s3693_s2, 4096  ;;  %p3021_p7 = pneg %p3007_p5 }
  0x27   : > { %p2493_p6 = scmp.ne.s32.totalorder %s3693_s2, %s2492_s10  ;;  %p2499_p10 = scmp.lt.u32.totalorder %s2492_s10, %s3693_s2 }
  0x29   : > { %p2495_p8 = pnand %p3021_p7, %p2493_p6 }
  0x2b   : > { %p2496_p9 = pneg %p2495_p8 }
  0x2d   : > { %p2501_p11 = pnand %p2499_p10, %p2496_p9 }
  0x2f   : > { %2504 = shalt.err (!%p2501_p11)
}
  0x30   : > { %s2505_s11 = scalar_lea.vmem %s310_s27, 4096  ;;  %p2513_p2 = scmp.lt.s32.totalorder %s310_s27, %s310_s27 }
  0x31   : > { %p2506_p12 = scmp.ne.s32.totalorder %s310_s27, %s2505_s11  ;;  %p2514_p4 = scmp.lt.s32.totalorder %s2505_s11, %s2505_s11 }
  0x33   : > { %p2508_p13 = pnand %p2506_p12, %p3021_p7  ;;  %p2515_p1 = por %p2514_p4, %p2513_p2 }
  0x35   : > { %p2509_p0 = pneg %p2508_p13 }
  0x37   : > { %p2516_p3 = pnand %p2515_p1, %p2509_p0 }
  0x39   : > { %2519 = shalt.err (!%p2516_p3)
}
  0x3a   : > { %s3660_s9 = smov 64   ;;  %s3662_s20 = smov 4  }
  0x3b   : > { %2247 = dma.hbm_to_vmem [thread:$0]  (!%p3007_p5), %s3693_s2, 4096, %s310_s27, [#allocation6], %s3660_s9, %s3660_s9, %s3662_s20  }
  0x3c   : > { %s3695_s3 = sld [smem:[#allocation35_spill]] }
  0x42   : > { %s2520_s19 = scalar_lea.hbm %s3695_s3, 8192 }
  0x43   : > { %p2521_p1 = scmp.ne.s32.totalorder %s3695_s3, %s2520_s19  ;;  %p2527_p8 = scmp.lt.u32.totalorder %s2520_s19, %s3695_s3 }
  0x45   : > { %p2523_p3 = pnand %p2521_p1, %p3021_p7 }
  0x47   : > { %p2524_p6 = pneg %p2523_p3 }
  0x49   : > { %p2529_p9 = pnand %p2527_p8, %p2524_p6 }
  0x4b   : > { %2532 = shalt.err (!%p2529_p9)
}
  0x4c   : > { %s2533_s27 = scalar_lea.vmem %s3011_s30, 8192  ;;  %p2541_p13 = scmp.lt.s32.totalorder %s3011_s30, %s3011_s30 }
  0x4d   : > { %p2534_p10 = scmp.ne.s32.totalorder %s3011_s30, %s2533_s27  ;;  %p2542_p0 = scmp.lt.s32.totalorder %s2533_s27, %s2533_s27 }
  0x4f   : > { %p2536_p11 = pnand %p2534_p10, %p3021_p7  ;;  %p2543_p2 = por %p2542_p0, %p2541_p13 }
  0x51   : > { %p2537_p12 = pneg %p2536_p11 }
  0x53   : > { %p2544_p4 = pnand %p2543_p2, %p2537_p12 }
  0x55   : > { %2547 = shalt.err (!%p2544_p4)
}
  0x56   : > { %s3664_s25 = smov 128   ;;  %s3665_s1 = smov 8  }
  0x57   : > { %2250 = dma.hbm_to_vmem [thread:$0]  (!%p3007_p5), %s3695_s3, 8192, %s3011_s30, [#allocation9], %s3664_s25, %s3664_s25, %s3665_s1  }
  0x58   : > { %s2870_s8 = smov [#allocation11]   ;;  %s2871_s12 = smov [#allocation10]  }
  0x59   : > { %s348_s10 = sshll.u32 %s2870_s8, 4  ;;  %s335_s29 = sshll.u32 %s2871_s12, 4  ;;  %s349_s10 = int_to_ptr.vmem [resolvable:$true] %s348_s10  ;;  %s3066_s29 = int_to_ptr.vmem [resolvable:$true] %s335_s29 }
  0x5a   : > { %s3696_s5 = sld [smem:[#allocation37_spill]] }
  0x60   : > { %s2548_s9 = scalar_lea.hbm %s3696_s5, 8192 }
  0x61   : > { %p2549_p1 = scmp.ne.s32.totalorder %s3696_s5, %s2548_s9  ;;  %p2555_p8 = scmp.lt.u32.totalorder %s2548_s9, %s3696_s5 }
  0x63   : > { %p2551_p3 = pnand %p2549_p1, %p3021_p7 }
  0x65   : > { %p2552_p6 = pneg %p2551_p3 }
  0x67   : > { %p2557_p9 = pnand %p2555_p8, %p2552_p6 }
  0x69   : > { %2560 = shalt.err (!%p2557_p9)
}
  0x6a   : > { %s2561_s19 = scalar_lea.vmem %s349_s10, 8192  ;;  %p2569_p13 = scmp.lt.s32.totalorder %s349_s10, %s349_s10 }
  0x6b   : > { %p2562_p10 = scmp.ne.s32.totalorder %s349_s10, %s2561_s19  ;;  %p2570_p0 = scmp.lt.s32.totalorder %s2561_s19, %s2561_s19 }
  0x6d   : > { %p2564_p11 = pnand %p2562_p10, %p3021_p7  ;;  %p2571_p2 = por %p2570_p0, %p2569_p13 }
  0x6f   : > { %p2565_p12 = pneg %p2564_p11 }
  0x71   : > { %p2572_p4 = pnand %p2571_p2, %p2565_p12 }
  0x73   : > { %2575 = shalt.err (!%p2572_p4)
}
  0x74   : > { %2256 = dma.hbm_to_vmem [thread:$0]  (!%p3007_p5), %s3696_s5, 8192, %s349_s10, [#allocation12], %s3664_s25, %s3664_s25, %s3665_s1  }
  0x75   : > { %s3697_s4 = sld [smem:[#allocation36_spill]] }
  0x7b   : > { %s2576_s12 = scalar_lea.hbm %s3697_s4, 4096 }
  0x7c   : > { %p2577_p1 = scmp.ne.s32.totalorder %s3697_s4, %s2576_s12  ;;  %p2583_p8 = scmp.lt.u32.totalorder %s2576_s12, %s3697_s4 }
  0x7e   : > { %p2579_p3 = pnand %p2577_p1, %p3021_p7 }
  0x80   : > { %p2580_p6 = pneg %p2579_p3 }
  0x82   : > { %p2585_p9 = pnand %p2583_p8, %p2580_p6 }
  0x84   : > { %2588 = shalt.err (!%p2585_p9)
}
  0x85   : > { %s2589_s10 = scalar_lea.vmem %s3066_s29, 4096  ;;  %p2597_p13 = scmp.lt.s32.totalorder %s3066_s29, %s3066_s29 }
  0x86   : > { %p2590_p10 = scmp.ne.s32.totalorder %s3066_s29, %s2589_s10  ;;  %p2598_p0 = scmp.lt.s32.totalorder %s2589_s10, %s2589_s10 }
  0x88   : > { %p2592_p11 = pnand %p2590_p10, %p3021_p7  ;;  %p2599_p2 = por %p2598_p0, %p2597_p13 }
  0x8a   : > { %p2593_p12 = pneg %p2592_p11 }
  0x8c   : > { %p2600_p4 = pnand %p2599_p2, %p2593_p12 }
  0x8e   : > { %2603 = shalt.err (!%p2600_p4)
}
  0x8f   : > { %s3698_s19 = smov 4   ;;  %s3699_s2 = smov 64  }
  0x90   : > { %2253 = dma.hbm_to_vmem [thread:$0]  (!%p3007_p5), %s3697_s4, 4096, %s3066_s29, [#allocation9], %s3699_s2, %s3699_s2, %s3698_s19  }
  0x91   : > { %s2872_s8 = smov [#allocation13]   ;;  %s2873_s11 = smov [#allocation14]  }
  0x92   : > { %s361_s12 = sshll.u32 %s2872_s8, 4  ;;  %s374_s27 = sshll.u32 %s2873_s11, 4  ;;  %s362_s12 = int_to_ptr.vmem [resolvable:$true] %s361_s12  ;;  %s3115_s27 = int_to_ptr.vmem [resolvable:$true] %s374_s27 }
  0x93   : > { %s3700_s6 = sld [smem:[#allocation38_spill]] }
  0x99   : > { %s2604_s10 = scalar_lea.hbm %s3700_s6, 8192 }
  0x9a   : > { %p2605_p1 = scmp.ne.s32.totalorder %s3700_s6, %s2604_s10  ;;  %p2611_p8 = scmp.lt.u32.totalorder %s2604_s10, %s3700_s6 }
  0x9c   : > { %p2607_p3 = pnand %p2605_p1, %p3021_p7 }
  0x9e   : > { %p2608_p6 = pneg %p2607_p3 }
  0xa0   : > { %p2613_p9 = pnand %p2611_p8, %p2608_p6 }
  0xa2   : > { %2616 = shalt.err (!%p2613_p9)
}
  0xa3   : > { %s2617_s20 = scalar_lea.vmem %s362_s12, 8192  ;;  %p2625_p13 = scmp.lt.s32.totalorder %s362_s12, %s362_s12 }
  0xa4   : > { %p2618_p10 = scmp.ne.s32.totalorder %s362_s12, %s2617_s20  ;;  %p2626_p0 = scmp.lt.s32.totalorder %s2617_s20, %s2617_s20 }
  0xa6   : > { %p2620_p11 = pnand %p2618_p10, %p3021_p7  ;;  %p2627_p2 = por %p2626_p0, %p2625_p13 }
  0xa8   : > { %p2621_p12 = pneg %p2620_p11 }
  0xaa   : > { %p2628_p4 = pnand %p2627_p2, %p2621_p12 }
  0xac   : > { %2631 = shalt.err (!%p2628_p4)
}
  0xad   : > { %2259 = dma.hbm_to_vmem [thread:$0]  (!%p3007_p5), %s3700_s6, 8192, %s362_s12, [#allocation12], %s3699_s2, %s3699_s2, %s3698_s19  }
  0xae   : > { %s3701_s7 = sld [smem:[#allocation39_spill]] }
  0xb4   : > { %s2632_s13 = scalar_lea.hbm %s3701_s7, 512 }
  0xb5   : > { %p2633_p1 = scmp.ne.s32.totalorder %s3701_s7, %s2632_s13  ;;  %p2639_p8 = scmp.lt.u32.totalorder %s2632_s13, %s3701_s7 }
  0xb7   : > { %p2635_p3 = pnand %p2633_p1, %p3021_p7 }
  0xb9   : > { %p2636_p6 = pneg %p2635_p3 }
  0xbb   : > { %p2641_p9 = pnand %p2639_p8, %p2636_p6 }
  0xbd   : > { %2644 = shalt.err (!%p2641_p9)
}
  0xbe   : > { %s2645_s19 = scalar_lea.vmem %s3115_s27, 512  ;;  %p2653_p13 = scmp.lt.s32.totalorder %s3115_s27, %s3115_s27 }
  0xbf   : > { %p2646_p10 = scmp.ne.s32.totalorder %s3115_s27, %s2645_s19  ;;  %p2654_p0 = scmp.lt.s32.totalorder %s2645_s19, %s2645_s19 }
  0xc1   : > { %p2648_p11 = pnand %p2646_p10, %p3021_p7  ;;  %p2655_p2 = por %p2654_p0, %p2653_p13 }
  0xc3   : > { %p2649_p12 = pneg %p2648_p11 }
  0xc5   : > { %p2656_p4 = pnand %p2655_p2, %p2649_p12 }
  0xc7   : > { %2659 = shalt.err (!%p2656_p4)
}
  0xc8   : > { %s3702_s2 = smov 8   ;;  %s3703_s12 = smov 128  }
  0xc9   : > { %2262 = dma.hbm_to_vmem [thread:$0]  (!%p3007_p5), %s3701_s7, 512, %s3115_s27, [#allocation15], %s3703_s12, %s3703_s12, %s3702_s2  }
  0xca   : > { %s1955_s28 = sadd.s32 4294967294, %s2862_s23   ;;  %s44_s26 = sadd.s32 1, %s2858_s22 }
  0xcb   : > { %s51_s1 = sadd.s32 1, %s2842_s18  ;;  %p58_p7 = scmp.ne.s32.totalorder %s2842_s18, %s2838_s17 }
  0xcc   : > { %p3667_p1 = scmp.eq.s32.totalorder %s2862_s23, 0  ;;  %p64_p3 = scmp.ne.s32.totalorder %s2838_s17, %s2834_s16 }
  0xcd   : > { %p284_p6 = scmp.eq.s32.totalorder %s2994_s24, 7  ;;  %p290_p8 = scmp.eq.s32.totalorder %s1955_s28, 7 }
  0xce   : > { %p60_p9 = por %p3667_p1, %p58_p7  ;;  %p3704_p10 = scmp.eq.s32.totalorder %s2994_s24, 0 }
  0xcf   : > { %p3181_p12 = por %p284_p6, %p58_p7  ;;  %p3185_p5 = por %p290_p8, %p64_p3 }
  0xd0   : > { %p3177_p11 = por %p3704_p10, %p64_p3  ;;  %p3666_p13 = scmp.lt.s32.totalorder %s2862_s23, 8 }
  0xd1   : > { %s3706_s11 = scalar_select %p3181_p12, 1, 0 }
  0xd2   : > { %s3708_s27 = scalar_select %p3185_p5, 1, 0 }
  0xd3   : > { %3707 = sst [smem:[#allocation29_spill]] %s3706_s11  ;;  %s394_s13 = sand.u32 1, %s2842_s18  }
  0xd4   : > { %3709 = sst [smem:[#allocation30_spill]] %s3708_s27  ;;  %s1964_s30 = sshll.u32 %s394_s13, 3 }
  0xd5   : > { %s1965_s10 = sshll.u32 %s2858_s22, 7  ;;  %s3710_s0 = sld [smem:[#allocation32_spill]] }
  0xd6   : > { %s398_s2 = scalar_lea.vmem [#allocation2], %s1964_s30  ;;  %p3201_p0 = pnand %p3666_p13, %p60_p9 }
  0xd7   : > { %s405_s12 = sshll.u32 %s398_s2, 4  ;;  %s395_s25 = scalar_lea.sflag [#allocation3], %s394_s13  ;;  %s3197_s12 = int_to_ptr.vmem [resolvable:$true] %s405_s12 }
  0xd8   : > { %p2662_p4 = pneg %p3201_p0 }
  0xdb   : > { %s3195_s19 = scalar_lea.hbm %s3710_s0, %s1965_s10  ;;  %s2665_s9 = scalar_lea.hbm %s3710_s0, 256 }
  0xdc   : > { %s2660_s28 = scalar_lea.hbm %s3195_s19, 128  ;;  %p2666_p6 = scmp.lt.u32.totalorder %s3195_s19, %s3710_s0 }
  0xdd   : > { %p2661_p2 = scmp.ne.s32.totalorder %s3195_s19, %s2660_s28  ;;  %p2667_p8 = scmp.lt.u32.totalorder %s2665_s9, %s2660_s28 }
  0xde   : > { %p2669_p10 = scmp.lt.u32.totalorder %s2660_s28, %s3195_s19 }
  0xdf   : > { %p2663_p7 = pnand %p2662_p4, %p2661_p2  ;;  %p2668_p9 = por %p2667_p8, %p2666_p6 }
  0xe1   : > { %p2664_p3 = pneg %p2663_p7  ;;  %p2670_p13 = por %p2669_p10, %p2668_p9 }
  0xe3   : > { %p2671_p1 = pnand %p2670_p13, %p2664_p3 }
  0xe5   : > { %2674 = shalt.err (!%p2671_p1)
}
  0xe6   : > { %s2675_s13 = scalar_lea.vmem %s3197_s12, 128  ;;  %s2874_s30 = smov [#allocation2]  }
  0xe7   : > { %p2676_p2 = scmp.ne.s32.totalorder %s3197_s12, %s2675_s13  ;;  %s2680_s10 = sshll.u32 %s2874_s30, 4  ;;  %s2681_s10 = int_to_ptr.vmem [resolvable:$false] %s2680_s10 }
  0xe8   : > { %s2682_s29 = scalar_lea.vmem %s2681_s10, 256  ;;  %p2683_p12 = scmp.lt.s32.totalorder %s3197_s12, %s2681_s10 }
  0xe9   : > { %p2678_p7 = pnand %p2676_p2, %p2662_p4  ;;  %p2684_p6 = scmp.lt.s32.totalorder %s2682_s29, %s2675_s13 }
  0xeb   : > { %p2679_p5 = pneg %p2678_p7  ;;  %p2685_p8 = por %p2684_p6, %p2683_p12 }
  0xed   : > { %p2686_p9 = pnand %p2685_p8, %p2679_p5 }
  0xef   : > { %2689 = shalt.err (!%p2686_p9)
}
  0xf0   : > { %s3712_s28 = sld [smem:[#allocation24_spill]]  ;;  %s41_s9 = sadd.s32 1, %s2854_s21 }
  0xf1   : > { %2266 = dma.hbm_to_vmem [thread:$0]  (!%p3201_p0), %s3195_s19, 128, %s3197_s12, %s395_s25  }
  0xf2   : > { %p42_p1 = scmp.ge.s32.totalorder %s41_s9, 4  ;;  %s79_s20 = sadd.s32 1, %s2830_s15 }
  0xf3   : > { %p86_p12 = scmp.ne.s32.totalorder %s2830_s15, %s2826_s14  ;;  %p3714_p13 = scmp.eq.s32.totalorder %s2862_s23, 0 }
  0xf4   : > { %s3756_s9 = smov (%p42_p1, %s41_s9), 0  ;;  %s3758_s26 = smov (!%p42_p1, %s44_s26), %s2858_s22 }
  0xf5   : > { %3713 = sst [smem:[#allocation31_spill]] %s3756_s9  ;;  %s74_s2 = ssub.s32 %s2854_s21, %s3756_s9 }
  0xf6   : > { %p92_p5 = scmp.ne.s32.totalorder %s2826_s14, %s3712_s28  ;;  %p3245_p4 = por %p86_p12, %p3714_p13 }
  0xf7   : > { %p46_p0 = scmp.ge.s32.totalorder %s3758_s26, 2  ;;  %p3716_p3 = scmp.eq.s32.totalorder %s2994_s24, 0 }
  0xf8   : > { %s412_s25 = sand.u32 1, %s2862_s23   ;;  %s414_s13 = sand.u32 1, %s2830_s15  }
  0xf9   : > { %p3251_p10 = por %p92_p5, %p3716_p3  ;;  %s3760_s26 = smov (%p46_p0, %s3758_s26), 0 }
  0xfa   : > { %s1966_s30 = sshll.u32 %s414_s13, 3  ;;  %s48_s10 = ssub.s32 %s2858_s22, %s3760_s26 }
  0xfb   : > { %s3717_s12 = scalar_select %p3251_p10, 1, 0 }
  0xfc   : > { %p49_p2 = scmp.eq.s32.totalorder %s48_s10, 0  ;;  %s76_s29 = sor.u32 %s74_s2, %s48_s10 }
  0xfd   : > { %p77_p7 = scmp.eq.s32.totalorder %s76_s29, 0  ;;  %s1967_s28 = sshll.u32 %s2854_s21, 1 }
  0xfe   : > { %s3265_s0 = scalar_select %p49_p2, %s2842_s18, %s51_s1  }
  0xff   : > { %s3268_s3 = scalar_select %p77_p7, %s2830_s15, %s79_s20  }
 0x100   : > { %s421_s4 = sadd.s32 %s2858_s22, %s1967_s28  ;;  %s416_s5 = scalar_lea.vmem [#allocation5], %s1966_s30 }
 0x101   : > { %s425_s6 = sshll.u32 %s416_s5, 4  ;;  %s1968_s7 = sshll.u32 %s421_s4, 7  ;;  %s3271_s6 = int_to_ptr.vmem [resolvable:$true] %s425_s6 }
 0x102   : > { %s3718_s16 = sld [smem:[#allocation33_spill]]  ;;  %p3720_p6 = scmp.lt.s32.totalorder %s2862_s23, 8 }
 0x103   : > { %s413_s4 = scalar_lea.sflag [#allocation6], %s412_s25 }
 0x104   : > { %p3282_p8 = pnand %p3720_p6, %p3245_p4 }
 0x106   : > { %p2692_p1 = pneg %p3282_p8 }
 0x108   : > { %s3719_s11 = smov %s3718_s16  ;;  %s3276_s13 = scalar_lea.hbm %s3718_s16, %s1968_s7 }
 0x109   : > { %s2690_s5 = scalar_lea.hbm %s3276_s13, 128  ;;  %s2695_s27 = scalar_lea.hbm %s3719_s11, 1024 }
 0x10a   : > { %p2691_p9 = scmp.ne.s32.totalorder %s3276_s13, %s2690_s5  ;;  %p2696_p13 = scmp.lt.u32.totalorder %s3276_s13, %s3719_s11 }
 0x10b   : > { %p2697_p4 = scmp.lt.u32.totalorder %s2695_s27, %s2690_s5  ;;  %p2699_p3 = scmp.lt.u32.totalorder %s2690_s5, %s3276_s13 }
 0x10c   : > { %p2693_p12 = pnand %p2692_p1, %p2691_p9 }
 0x10d   : > { %p2698_p0 = por %p2697_p4, %p2696_p13 }
 0x10e   : > { %p2694_p5 = pneg %p2693_p12 }
 0x10f   : > { %p2700_p2 = por %p2699_p3, %p2698_p0 }
 0x111   : > { %p2701_p7 = pnand %p2700_p2, %p2694_p5 }
 0x113   : > { %2704 = shalt.err (!%p2701_p7)
}
 0x114   : > { %s2705_s2 = scalar_lea.vmem %s3271_s6, 128  ;;  %s2875_s19 = smov [#allocation5]  }
 0x115   : > { %p2706_p6 = scmp.ne.s32.totalorder %s3271_s6, %s2705_s2  ;;  %s2710_s25 = sshll.u32 %s2875_s19, 4  ;;  %s2711_s25 = int_to_ptr.vmem [resolvable:$false] %s2710_s25 }
 0x116   : > { %s2712_s30 = scalar_lea.vmem %s2711_s25, 256  ;;  %p2713_p10 = scmp.lt.s32.totalorder %s3271_s6, %s2711_s25 }
 0x117   : > { %p2708_p9 = pnand %p2706_p6, %p2692_p1  ;;  %p2714_p13 = scmp.lt.s32.totalorder %s2712_s30, %s2705_s2 }
 0x119   : > { %p2709_p12 = pneg %p2708_p9  ;;  %p2715_p4 = por %p2714_p13, %p2713_p10 }
 0x11b   : > { %p2716_p0 = pnand %p2715_p4, %p2709_p12 }
 0x11d   : > { %2719 = shalt.err (!%p2716_p0)
}
 0x11e   : > { %2269 = dma.hbm_to_vmem [thread:$0]  (!%p3282_p8), %s3276_s13, 128, %s3271_s6, %s413_s4  }
 0x11f   : > { %s3722_s10 = sld [smem:[#allocation28_spill]] }
 0x125   : > { %p3723_p5 = scmp.ne.s32.totalorder %s3722_s10, 0 }
 0x126   : > { %s3314_s29 = sand.u32 (!%p3723_p5), 1, %s2838_s17  }
 0x127   : > { %434 = sbr.rel (%p3723_p5) target bundleno = 2882 (0xb42), region = 60  ;;  %s1970_s28 = sshll.u32 (!%p3723_p5), %s3314_s29, 3 }
 0x128   : > { %s437_s5 = scalar_lea.sflag (!%p3723_p5), [#allocation3], %s3314_s29  ;;  %s440_s7 = scalar_lea.vmem (!%p3723_p5), [#allocation2], %s1970_s28 }
 0x12e   : > { %2793 = dma.done.wait (%p3177_p11), %s437_s5, 128  }
 0x12f   : > { %2795 = vsyncadd (%p3177_p11), %s437_s5, 4294967168  ;;  %s445_s6 = sand.u32 1, %s2994_s24   ;;  %s447_s13 = sand.u32 1, %s2826_s14  }
 0x130   : > { %s3324_s1 = sshll.u32 %s447_s13, 3  ;;  %s446_s4 = scalar_lea.sflag [#allocation6], %s445_s6 }
 0x131   : > { %s449_s16 = scalar_lea.vmem [#allocation5], %s3324_s1  ;;  %p3724_p10 = scmp.ne.s32.totalorder %s3717_s12, 0 }
 0x133   : > { %2797 = dma.done.wait (%p3724_p10), %s446_s4, 128  }
 0x134   : > { %2799 = vsyncadd (%p3724_p10), %s446_s4, 4294967168  ;;  %p3725_p8 = scmp.eq.s32.totalorder %s2994_s24, 0 }
 0x136   : > { %2801 = dma.done.wait (%p3725_p8), [#allocation6], 4096   ;;  %p3726_p11 = pmov %p3725_p8 }
 0x137   : > { %p3727_p1 = pmov %p3725_p8 }
 0x138   : > { %2803 = vsyncadd (%p3726_p11), [#allocation6], 4294963200 }
 0x139   : > { %2805 = dma.done.wait (%p3727_p1), [#allocation9], 12288   ;;  %p3728_p3 = pmov %p3727_p1 }
 0x13a   : > { %p3729_p2 = pmov %p3727_p1 }
 0x13b   : > { %2807 = vsyncadd (%p3728_p3), [#allocation9], 4294955008 }
 0x13c   : > { %2809 = dma.done.wait (%p3729_p2), [#allocation12], 16384   ;;  %p3730_p7 = pmov %p3727_p1 }
 0x13d   : > { %p3731_p6 = pmov %p3727_p1 }
 0x13e   : > { %2811 = vsyncadd (%p3730_p7), [#allocation12], 4294950912 }
 0x13f   : > { %2813 = dma.done.wait (%p3731_p6), [#allocation15], 512   ;;  %p3732_p9 = pmov %p3727_p1 }
 0x140   : > { %s3347_s8 = scalar_lea.vmem [#allocation16], %s1970_s28  ;;  %s3733_s12 = sld [smem:[#allocation26_spill]] }
 0x141   : > { %2815 = vsyncadd (%p3732_p9), [#allocation15], 4294966784 }
 0x146   : > { %p1979_p12 = scmp.ne.s32.totalorder %s3733_s12, 0 }
 0x147   : > { %v520_v0 = vld [vmem:[%s440_s7] sm:$0xff] (!%p1979_p12) }
 0x148   : > { %519 = sbr.rel (%p1979_p12) target bundleno = 335 (0x14f), region = 96  ;;  %521 = vst [vmem:[%s3347_s8] sm:$0xff] (!%p1979_p12), %v520_v0 }
 0x14f PF: > { %s3734_s27 = sld [smem:[#allocation26_spill]]  ;;  %v2876_v1 = vmov 0.0   ;;  %v2877_v2 = vmov 0   ;;  %vm2878_vm0 = vmmov 0   ;;  %v523_v26 = vld [vmem:[%s449_s16] sm:$0xff]  ;;  %v3406_v28 = vld [vmem:[%s3347_s8] sm:$0xff]  ;;  %v641_v31 = vlaneseq }
 0x150   : > { %2126 = vmatprep.subr.bf16.mxu0 %v2876_v1  ;;  %857 = vmatprep.mubr.bf16.mxu1 %v2877_v2  ;;  %v733_v29 = vpack.c.bf16 %v523_v26, %v523_v26  ;;  %v640_v30 = vpack.c.bf16 %v3406_v28, %v3406_v28  ;;  %s3735_s7 = sld [smem:[#allocation40_spill]]  ;;  %vm909_vm1 = vcmask 261120   ;;  %s2879_s1 = smov 64   ;;  %vm1146_vm2 = vcmask 1043456  }
 0x151   : > { %2142 = vmatprep.mubr.msk.bf16.mxu0 %vm2878_vm0, %v2876_v1  ;;  %v3418_v32 = vshrl.u32 %v641_v31, 7  ;;  %s2880_s4 = smov 96   ;;  %s2881_s16 = smov 32   ;;  %vm1094_vm3 = vcmask 64512   ;;  %vm1341_vm4 = vcmask 523264   ;;  %vm1343_vm5 = vcmask 785408  }
 0x152   : > { %s3739_s5 = sld [smem:[#allocation42_spill]] }
 0x153   : > { %v3427_v33 = vsub.s32 0, %v3418_v32  ;;  %v3430_v35 = vsub.s32 1, %v3418_v32 }
 0x155   : > { %s3352_s9 = sshll.u32 %s3734_s27, 7  ;;  %s2065_s20 = sshll.u32 %s3734_s27, 6 }
 0x156   : > { %s3358_s24 = scalar_lea.vmem [#allocation8], %s3352_s9  ;;  %s3366_s2 = scalar_lea.vmem [#allocation7], %s2065_s20 }
 0x157   : > { %v2392_v3 = vld [vmem:[%s3358_s24 + $0x4] ss:$8 sps:$4 sm:$0xff]   ;;  %v2394_v4 = vld [vmem:[%s3358_s24] ss:$8 sps:$4 sm:$0xff]   ;;  %v2396_v6 = vld [vmem:[%s3358_s24 + $0x14] ss:$8 sps:$4 sm:$0xff]  }
 0x158   : > { %825 = vmatprep.subr.bf16.mxu1 %v2392_v3  ;;  %v2395_v5 = vld [vmem:[%s3366_s2] sm:$0xff]   ;;  %v2398_v7 = vld [vmem:[%s3358_s24 + $0x10] ss:$8 sps:$4 sm:$0xff]   ;;  %v2399_v8 = vld [vmem:[%s3366_s2 + $0x8] sm:$0xff]   ;;  %s3391_s19 = scalar_lea.vmem [#allocation10], %s2065_s20  ;;  %s3398_s25 = scalar_lea.vmem [#allocation13], %s3352_s9 }
 0x159   : > { %826 = vmatpush1.bf16.msra.mxu1 %v2394_v4  ;;  %2127 = vmatpush3.bf16.msra.mxu0 %v2395_v5  ;;  %v2400_v9 = vld [vmem:[%s3358_s24 + $0x24] ss:$8 sps:$4 sm:$0xff]   ;;  %v2402_v10 = vld [vmem:[%s3358_s24 + $0x20] ss:$8 sps:$4 sm:$0xff]   ;;  %v2403_v11 = vld [vmem:[%s3366_s2 + $0x10] sm:$0xff]   ;;  %s1988_s30 = sshll.u32 %s3734_s27, 1 }
 0x15a   : > { %827 = vmatprep.subr.bf16.mxu1 %v2396_v6  ;;  %2128 = vmatprep.subr.bf16.mxu0 %v2876_v1  ;;  %v2404_v12 = vld [vmem:[%s3358_s24 + $0x34] ss:$8 sps:$4 sm:$0xff]   ;;  %v2406_v13 = vld [vmem:[%s3358_s24 + $0x30] ss:$8 sps:$4 sm:$0xff]   ;;  %v2408_v15 = vld [vmem:[%s3358_s24 + $0x44] ss:$8 sps:$4 sm:$0xff]   ;;  %s636_s6 = scalar_lea.vmem %s3735_s7, %s1988_s30 }
 0x15b   : > { %v2407_v14 = vld [vmem:[%s3366_s2 + $0x18] sm:$0xff]   ;;  %v2410_v16 = vld [vmem:[%s3358_s24 + $0x40] ss:$8 sps:$4 sm:$0xff]   ;;  %v2416_v21 = vld [vmem:[%s3358_s24 + $0x64] ss:$8 sps:$4 sm:$0xff]   ;;  %s1987_s10 = sshll.u32 %s3734_s27, 3 }
 0x15c   : > { %v2411_v17 = vld [vmem:[%s3366_s2 + $0x20] sm:$0xff]   ;;  %v2412_v18 = vld [vmem:[%s3358_s24 + $0x54] ss:$8 sps:$4 sm:$0xff]   ;;  %v2414_v19 = vld [vmem:[%s3358_s24 + $0x50] ss:$8 sps:$4 sm:$0xff]   ;;  %s633_s13 = scalar_lea.vmem [#allocation14], %s1987_s10 }
 0x15d   : > { %828 = vmatpush1.bf16.msra.mxu1 %v2398_v7  ;;  %2129 = vmatpush3.bf16.msra.mxu0 %v2399_v8  ;;  %v2415_v20 = vld [vmem:[%s3366_s2 + $0x28] sm:$0xff]   ;;  %v2419_v23 = vld [vmem:[%s3366_s2 + $0x30] sm:$0xff]   ;;  %v2423_v27 = vld [vmem:[%s3366_s2 + $0x38] sm:$0xff]   ;;  %s3523_s12 = scalar_lea.vmem [#allocation11], %s3352_s9  ;;  %s3737_s27 = sld [smem:[#allocation27_spill]] }
 0x15e   : > { %829 = vmatprep.subr.bf16.mxu1 %v2400_v9  ;;  %2130 = vmatprep.subr.bf16.mxu0 %v2876_v1  ;;  %v2418_v22 = vld [vmem:[%s3358_s24 + $0x60] ss:$8 sps:$4 sm:$0xff]   ;;  %v2420_v24 = vld [vmem:[%s3358_s24 + $0x74] ss:$8 sps:$4 sm:$0xff]   ;;  %v2422_v25 = vld [vmem:[%s3358_s24 + $0x70] ss:$8 sps:$4 sm:$0xff]  }
 0x15f   : > { %v637_v34 = vld [vmem:[%s636_s6] sm:$0x3]  ;;  %s3736_s24 = sld [smem:[#allocation41_spill]]  ;;  %s1762_s6 = scalar_lea.sflag [#allocation4], %s3314_s29 }
 0x160   : > { %v3432_v36 = vld [vmem:[%s633_s13] sm:$0xff]  ;;  %v738_v37 = vrot.slane %v637_v34, %v3427_v33  ;;  %v742_v38 = vrot.slane %v637_v34, %v3430_v35 }
 0x161   : > { %830 = vmatpush1.bf16.msra.mxu1 %v2402_v10  ;;  %2131 = vmatpush3.bf16.msra.mxu0 %v2403_v11  ;;  %v644_v39 = vrot.slane %v3432_v36, %v3427_v33 }
 0x162   : > { %831 = vmatprep.subr.bf16.mxu1 %v2404_v12  ;;  %2132 = vmatprep.subr.bf16.mxu0 %v2876_v1 }
 0x165   : > { %832 = vmatpush1.bf16.msra.mxu1 %v2406_v13  ;;  %2133 = vmatpush3.bf16.msra.mxu0 %v2407_v14  ;;  %s638_s2 = scalar_lea.vmem %s3736_s24, %s1988_s30  ;;  %s1775_s30 = sshll.u32 %s3347_s8, 4  ;;  %s3581_s30 = int_to_ptr.vmem [resolvable:$true] %s1775_s30 }
 0x166   : > { %833 = vmatprep.subr.bf16.mxu1 %v2408_v15  ;;  %2134 = vmatprep.subr.bf16.mxu0 %v2876_v1  ;;  %s2720_s13 = scalar_lea.vmem %s3581_s30, 128 }
 0x167   : > { %p2721_p13 = scmp.ne.s32.totalorder %s3581_s30, %s2720_s13 }
 0x169   : > { %834 = vmatpush1.bf16.msra.mxu1 %v2410_v16  ;;  %2135 = vmatpush3.bf16.msra.mxu0 %v2411_v17 }
 0x16a   : > { %835 = vmatprep.subr.bf16.mxu1 %v2412_v18  ;;  %2136 = vmatprep.subr.bf16.mxu0 %v2876_v1 }
 0x16d   : > { %836 = vmatpush1.bf16.msra.mxu1 %v2414_v19  ;;  %2137 = vmatpush3.bf16.msra.mxu0 %v2415_v20 }
 0x16e   : > { %837 = vmatprep.subr.bf16.mxu1 %v2416_v21  ;;  %2138 = vmatprep.subr.bf16.mxu0 %v2876_v1 }
 0x171   : > { %838 = vmatpush1.bf16.msra.mxu1 %v2418_v22  ;;  %2139 = vmatpush3.bf16.msra.mxu0 %v2419_v23 }
 0x172   : > { %839 = vmatprep.subr.bf16.mxu1 %v2420_v24  ;;  %2140 = vmatprep.subr.bf16.mxu0 %v2876_v1 }
 0x175   : > { %840 = vmatpush1.bf16.msra.mxu1 %v2422_v25  ;;  %2141 = vmatpush3.bf16.msra.mxu0 %v2423_v27 }
 0x176   : > { %2146 = vmatprep.subr.bf16.mxu1 %v2876_v1  ;;  %2170 = vmatprep.subr.bf16.mxu0 %v2876_v1 }
 0x178   : > { %858 = vmatmul.mubr.bf16.vlgmr.msra.gmra.mrb[0].mxu1 %v733_v29  ;;  %2143 = vmatmul.mubr.bf16.vlgmr.msra.gmra.mrb[0].mxu0 %v640_v30 }
 0x179   : > { %2148 = vmatprep.mubr.msk.bf16.mxu1 %vm2878_vm0, %v2876_v1  ;;  %2172 = vmatprep.mubr.msk.bf16.mxu0 %vm2878_vm0, %v2876_v1 }
 0x24b   : > { %v859_v40 = vpop.f32.mrb[0].mxu1  ;;  %v727_v43 = vpop.f32.mrb[0].mxu0 }
 0x24c   : > { %v860_v41 = vadd.f32 %v859_v40, %v738_v37  ;;  %v861_v42 = vpop.f32.mrb[1].mxu1  ;;  %v728_v45 = vadd.f32 %v727_v43, %v644_v39  ;;  %v2144_v47 = vpop.f32.mrb[1].mxu0 }
 0x24d   : > { %v3438_v44 = vadd.f32 %v861_v42, %v742_v38  ;;  %v863_v46 = vpop.f32.mrb[2].mxu1  ;;  %v730_v49 = vpop.f32.mrb[2].mxu0 }
 0x24e   : > { %v864_v48 = vpop.f32.mrb[3].mxu1  ;;  %885 = vrot.lane.b32.xlu1 %v860_v41, %s2879_s1  ;;  %882 = vrot.lane.b32.xlu0 %v860_v41, %s2880_s4  ;;  %v891_v50 = vpack.c.bf16 %v860_v41, %v860_v41  ;;  %v866_v51 = vmul.f32 0.17677669, %v728_v45  ;;  %v2145_v52 = vpop.f32.mrb[3].mxu0 }
 0x24f   : > { %v905_v53 = vpack.c.bf16 %v3438_v44, %v3438_v44 }
 0x250   : > { %v914_v54 = vsel %vm909_vm1, %v891_v50, 0  ;;  %v877_v56 = vpack.c.bf16 %v866_v51, %v866_v51 }
 0x251   : > { %2147 = vmatpush3.bf16.xpose.msra.mxu1 %v914_v54  ;;  %v1148_v55 = vsel %vm1146_vm2, %v905_v53, 0 }
 0x252   : > { %2171 = vmatpush3.bf16.msra.mxu0 %v1148_v55  ;;  %871 = vrot.lane.b32.xlu1 %v866_v51, %s2879_s1 }
 0x253   : > { %868 = vrot.lane.b32.xlu0 %v866_v51, %s2880_s4  ;;  %2152 = vmatprep.subr.bf16.mxu1 %v2876_v1 }
 0x254   : > { %2182 = vmatprep.subr.bf16.mxu0 %v2876_v1 }
 0x256   : > { %874 = vrot.lane.b32.xlu1 %v866_v51, %s2881_s16 }
 0x257   : > { %888 = vrot.lane.b32.xlu0 %v860_v41, %s2881_s16 }
 0x258   : > { %2149 = vmatmul.mubr.msk.bf16.vlgmr.msra.gmra.mrb[4].mxu1 %vm909_vm1, %v877_v56 }
 0x259   : > { %2154 = vmatprep.mubr.msk.bf16.mxu1 %vm2878_vm0, %v2876_v1 }
 0x2c0   : > { %v883_v57 = vpop.permute.xlu0 %882  ;;  %v886_v60 = vpop.permute.xlu1 %885 }
 0x2c1   : > { %v892_v58 = vpack.c.bf16 %v883_v57, %v883_v57  ;;  %v893_v62 = vpack.c.bf16 %v886_v60, %v886_v60 }
 0x2c3   : > { %v960_v59 = vsel %vm909_vm1, %v892_v58, 0  ;;  %v1006_v0 = vsel %vm909_vm1, %v893_v62, 0 }
 0x2c4   : > { %2153 = vmatpush3.bf16.xpose.msra.mxu1 %v960_v59  ;;  %v872_v5 = vpop.permute.xlu1 %871 }
 0x2c5   : > { %2158 = vmatprep.subr.bf16.mxu1 %v2876_v1  ;;  %v869_v61 = vpop.permute.xlu0 %868  ;;  %v879_v6 = vpack.c.bf16 %v872_v5, %v872_v5 }
 0x2c6   : > { %v878_v63 = vpack.c.bf16 %v869_v61, %v869_v61 }
 0x2c8   : > { %v875_v8 = vpop.permute.xlu1 %874 }
 0x2c9   : > { %v889_v3 = vpop.permute.xlu0 %888  ;;  %v880_v9 = vpack.c.bf16 %v875_v8, %v875_v8 }
 0x2ca   : > { %v894_v4 = vpack.c.bf16 %v889_v3, %v889_v3 }
 0x2cb   : > { %2155 = vmatmul.mubr.msk.bf16.vlgmr.msra.gmra.mrb[8].mxu1 %vm909_vm1, %v878_v63 }
 0x2cc   : > { %2159 = vmatpush3.bf16.xpose.msra.mxu1 %v1006_v0  ;;  %2160 = vmatprep.mubr.msk.bf16.mxu1 %vm2878_vm0, %v2876_v1  ;;  %v1052_v7 = vsel %vm909_vm1, %v894_v4, 0 }
 0x2cd   : > { %2164 = vmatprep.subr.bf16.mxu1 %v2876_v1 }
 0x2d3   : > { %2161 = vmatmul.mubr.msk.bf16.vlgmr.msra.gmra.mrb[12].mxu1 %vm909_vm1, %v879_v6 }
 0x2d4   : > { %2165 = vmatpush3.bf16.xpose.msra.mxu1 %v1052_v7  ;;  %2166 = vmatprep.mubr.msk.bf16.mxu1 %vm2878_vm0, %v2876_v1 }
 0x2d5   : > { %2176 = vmatprep.subr.bf16.mxu1 %v2876_v1 }
 0x2db   : > { %2167 = vmatmul.mubr.msk.bf16.vlgmr.msra.gmra.mrb[16].mxu1 %vm909_vm1, %v880_v9 }
 0x2dc   : > { %2178 = vmatprep.mubr.msk.bf16.mxu1 %vm2878_vm0, %v2876_v1 }
 0x32b   : > { %v950_v10 = vpop.f32.mrb[4].mxu1 }
 0x32c   : > { %v2150_v11 = vpop.f32.mrb[5].mxu1  ;;  %v1095_v12 = vsel %vm1094_vm3, %v950_v10, -inf }
 0x32d   : > { %1096 = vmax.xlane.f32.xlu0 %v1095_v12  ;;  %v953_v13 = vpop.f32.mrb[6].mxu1 }
 0x32e   : > { %v2151_v14 = vpop.f32.mrb[7].mxu1 }
 0x39e   : > { %v996_v15 = vpop.f32.mrb[8].mxu1 }
 0x39f   : > { %v2156_v16 = vpop.f32.mrb[9].mxu1  ;;  %v1098_v17 = vsel %vm1094_vm3, %v996_v15, -inf }
 0x3a0   : > { %1099 = vmax.xlane.f32.xlu1 %v1098_v17  ;;  %v999_v18 = vpop.f32.mrb[10].mxu1 }
 0x3a1   : > { %v2157_v19 = vpop.f32.mrb[11].mxu1  ;;  %v2424_v18 = vld [vmem:[%s3391_s19] sm:$0xff]  }
 0x3a2   : > { %v2425_v19 = vld [vmem:[%s3391_s19 + $0x8] sm:$0xff]  }
 0x3a6   : > { %v1042_v20 = vpop.f32.mrb[12].mxu1 }
 0x3a7   : > { %v2162_v21 = vpop.f32.mrb[13].mxu1  ;;  %v1101_v22 = vsel %vm1094_vm3, %v1042_v20, -inf }
 0x3a8   : > { %1102 = vmax.xlane.f32.xlu0 %v1101_v22  ;;  %v1045_v23 = vpop.f32.mrb[14].mxu1 }
 0x3a9   : > { %v2163_v24 = vpop.f32.mrb[15].mxu1  ;;  %v2426_v23 = vld [vmem:[%s3391_s19 + $0x10] sm:$0xff]  }
 0x3ae   : > { %v1088_v25 = vpop.f32.mrb[16].mxu1 }
 0x3af   : > { %v2168_v26 = vpop.f32.mrb[17].mxu1  ;;  %v1104_v27 = vsel %vm1094_vm3, %v1088_v25, -inf }
 0x3b0   : > { %1105 = vmax.xlane.f32.xlu0 %v1104_v27  ;;  %v1091_v29 = vpop.f32.mrb[18].mxu1  ;;  %v2429_v26 = vld [vmem:[%s3391_s19 + $0x28] sm:$0xff]   ;;  %v2430_v27 = vld [vmem:[%s3391_s19 + $0x30] sm:$0xff]  }
 0x3b1   : > { %896 = vrot.lane.b32.xlu1 %v3438_v44, %s2880_s4  ;;  %v2169_v30 = vpop.f32.mrb[19].mxu1 }
 0x3ba   : > { %v1097_v31 = vpop.xlane.xlu0 %1096 }
 0x3bb   : > { %v1107_v34 = vsub.f32 %v950_v10, %v1097_v31 }
 0x3bd   : > { %v1111_v37 = vmul.f32 1.442695, %v1107_v34 }
 0x3bf   : > { %2472 = vpow2.f32 %v1111_v37  ;;  %v2431_v37 = vld [vmem:[%s3391_s19 + $0x38] sm:$0xff]  }
 0x3c9   : > { %v2473_v38 = vpop.eup %2472 }
 0x3ca   : > { %v1119_v39 = vsel %vm1094_vm3, %v2473_v38, 0.0 }
 0x3d5   : > { %1120 = vadd.xlane.f32.xlu1 %v1119_v39 }
 0x42d   : > { %v1100_v40 = vpop.xlane.xlu1 %1099 }
 0x42e   : > { %v1108_v41 = vsub.f32 %v996_v15, %v1100_v40 }
 0x430   : > { %v1113_v42 = vmul.f32 1.442695, %v1108_v41 }
 0x431   : > { %v897_v43 = vpop.permute.xlu1 %896 }
 0x432   : > { %2474 = vpow2.f32 %v1113_v42  ;;  %v906_v45 = vpack.c.bf16 %v897_v43, %v897_v43 }
 0x434   : > { %v1194_v46 = vsel %vm1146_vm2, %v906_v45, 0 }
 0x435   : > { %2177 = vmatpush3.bf16.msra.mxu1 %v1194_v46  ;;  %v1103_v47 = vpop.xlane.xlu0 %1102 }
 0x436   : > { %v1109_v48 = vsub.f32 %v1042_v20, %v1103_v47  ;;  %2188 = vmatprep.subr.bf16.mxu1 %v2876_v1 }
 0x438   : > { %v1115_v49 = vmul.f32 1.442695, %v1109_v48 }
 0x43a   : > { %2476 = vpow2.f32 %v1115_v49 }
 0x43c   : > { %v2475_v50 = vpop.eup %2474 }
 0x43d   : > { %v1106_v51 = vpop.xlane.xlu0 %1105  ;;  %v1122_v52 = vsel %vm1094_vm3, %v2475_v50, 0.0 }
 0x43e   : > { %v1110_v53 = vsub.f32 %v1088_v25, %v1106_v51  ;;  %1123 = vadd.xlane.f32.xlu0 %v1122_v52  ;;  %v2428_v25 = vld [vmem:[%s3391_s19 + $0x20] sm:$0xff]  }
 0x440   : > { %v1117_v54 = vmul.f32 1.442695, %v1110_v53  ;;  %v1349_v53 = vrot.slane %v3432_v36, %v3430_v35 }
 0x442   : > { %2478 = vpow2.f32 %v1117_v54 }
 0x444   : > { %v2477_v55 = vpop.eup %2476 }
 0x445   : > { %v1125_v56 = vsel %vm1094_vm3, %v2477_v55, 0.0 }
 0x446   : > { %1126 = vadd.xlane.f32.xlu1 %v1125_v56 }
 0x44c   : > { %v2479_v57 = vpop.eup %2478 }
 0x44d   : > { %v1128_v58 = vsel %vm1094_vm3, %v2479_v57, 0.0 }
 0x44e   : > { %1129 = vadd.xlane.f32.xlu0 %v1128_v58 }
 0x457   : > { %902 = vrot.lane.b32.xlu1 %v3438_v44, %s2881_s16 }
 0x462   : > { %v1121_v59 = vpop.xlane.xlu1 %1120 }
 0x463   : > { %2480 = vrcp.f32 %v1121_v59 }
 0x464   : > { %899 = vrot.lane.b32.xlu0 %v3438_v44, %s2879_s1 }
 0x46d   : > { %v2481_v60 = vpop.eup %2480 }
 0x46e   : > { %v1135_v61 = vmul.f32 %v2481_v60, %v2473_v38  ;;  %v2432_v60 = vld [vmem:[%s3523_s12] ss:$8 sps:$4 sm:$0xff]  }
 0x470   : > { %v1139_v62 = vpack.c.bf16 %v1135_v61, %v1135_v61  ;;  %v2434_v61 = vld [vmem:[%s3523_s12 + $0x4] ss:$8 sps:$4 sm:$0xff]  }
 0x472   : > { %2173 = vmatmul.mubr.msk.bf16.vlgmr.msra.gmra.mrb[4].mxu0 %vm1094_vm3, %v1139_v62  ;;  %v2437_v62 = vld [vmem:[%s3523_s12 + $0x14] ss:$8 sps:$4 sm:$0xff]  }
 0x473   : > { %2184 = vmatprep.mubr.msk.bf16.mxu0 %vm2878_vm0, %v2876_v1 }
 0x4cb   : > { %v1124_v63 = vpop.xlane.xlu0 %1123 }
 0x4cc   : > { %2482 = vrcp.f32 %v1124_v63  ;;  %v2435_v63 = vld [vmem:[%s3523_s12 + $0x10] ss:$8 sps:$4 sm:$0xff]  }
 0x4d3   : > { %v1127_v0 = vpop.xlane.xlu1 %1126 }
 0x4d4   : > { %2484 = vrcp.f32 %v1127_v0  ;;  %v2440_v0 = vld [vmem:[%s3523_s12 + $0x24] ss:$8 sps:$4 sm:$0xff]  }
 0x4d6   : > { %v2483_v3 = vpop.eup %2482 }
 0x4d7   : > { %v1136_v4 = vmul.f32 %v2483_v3, %v2475_v50  ;;  %v903_v5 = vpop.permute.xlu1 %902 }
 0x4d8   : > { %v908_v6 = vpack.c.bf16 %v903_v5, %v903_v5 }
 0x4d9   : > { %v1140_v7 = vpack.c.bf16 %v1136_v4, %v1136_v4 }
 0x4da   : > { %v1286_v8 = vsel %vm1146_vm2, %v908_v6, 0 }
 0x4db   : > { %2179 = vmatmul.mubr.msk.bf16.vlgmr.msra.gmra.mrb[20].mxu1 %vm1094_vm3, %v1140_v7  ;;  %v1130_v44 = vpop.xlane.xlu0 %1129  ;;  %v2443_v7 = vld [vmem:[%s3523_s12 + $0x34] ss:$8 sps:$4 sm:$0xff]  }
 0x4dc   : > { %2189 = vmatpush3.bf16.msra.mxu1 %v1286_v8  ;;  %2486 = vrcp.f32 %v1130_v44  ;;  %2190 = vmatprep.mubr.msk.bf16.mxu1 %vm2878_vm0, %v2876_v1  ;;  %v2441_v8 = vld [vmem:[%s3523_s12 + $0x30] ss:$8 sps:$4 sm:$0xff]   ;;  %v2446_v44 = vld [vmem:[%s3523_s12 + $0x44] ss:$8 sps:$4 sm:$0xff]  }
 0x4dd   : > { %1553 = vmatprep.subr.bf16.mxu1 %v2434_v61  ;;  %v1600_v61 = vsub.s32 6, %v3418_v32 }
 0x4de   : > { %v2485_v9 = vpop.eup %2484 }
 0x4df   : > { %v900_v10 = vpop.permute.xlu0 %899  ;;  %v1137_v11 = vmul.f32 %v2485_v9, %v2477_v55  ;;  %v2444_v9 = vld [vmem:[%s3523_s12 + $0x40] ss:$8 sps:$4 sm:$0xff]  }
 0x4e0   : > { %v907_v12 = vpack.c.bf16 %v900_v10, %v900_v10  ;;  %v2449_v10 = vld [vmem:[%s3523_s12 + $0x54] ss:$8 sps:$4 sm:$0xff]  }
 0x4e1   : > { %v1141_v14 = vpack.c.bf16 %v1137_v11, %v1137_v11  ;;  %v2447_v11 = vld [vmem:[%s3523_s12 + $0x50] ss:$8 sps:$4 sm:$0xff]  }
 0x4e2   : > { %v1240_v13 = vsel %vm1146_vm2, %v907_v12, 0  ;;  %v2452_v12 = vld [vmem:[%s3523_s12 + $0x64] ss:$8 sps:$4 sm:$0xff]  }
 0x4e3   : > { %2183 = vmatpush3.bf16.msra.mxu0 %v1240_v13  ;;  %v2450_v13 = vld [vmem:[%s3523_s12 + $0x60] ss:$8 sps:$4 sm:$0xff]  }
 0x4e4   : > { %2194 = vmatprep.subr.bf16.mxu0 %v2876_v1 }
 0x4e6   : > { %v2487_v15 = vpop.eup %2486  ;;  %2185 = vmatmul.mubr.msk.bf16.vlgmr.msra.gmra.mrb[8].mxu0 %vm1094_vm3, %v1141_v14  ;;  %v2455_v14 = vld [vmem:[%s3523_s12 + $0x74] ss:$8 sps:$4 sm:$0xff]  }
 0x4e7   : > { %v1138_v16 = vmul.f32 %v2487_v15, %v2479_v57  ;;  %2210 = vmatprep.mubr.msk.bf16.mxu0 %vm2878_vm0, %v2876_v1  ;;  %2195 = vmatpush3.bf16.msra.mxu0 %v2424_v18  ;;  %v2453_v15 = vld [vmem:[%s3523_s12 + $0x70] ss:$8 sps:$4 sm:$0xff]   ;;  %v2458_v18 = vld [vmem:[%s3398_s25 + $0x48] sm:$0xff]  }
 0x4e8   : > { %2196 = vmatprep.subr.bf16.mxu0 %v2876_v1 }
 0x4e9   : > { %v1142_v17 = vpack.c.bf16 %v1138_v16, %v1138_v16  ;;  %v2456_v16 = vld [vmem:[%s3398_s25 + $0x40] sm:$0xff]  }
 0x4eb   : > { %2191 = vmatmul.mubr.msk.bf16.vlgmr.msra.gmra.mrb[24].mxu1 %vm1094_vm3, %v1142_v17  ;;  %2197 = vmatpush3.bf16.msra.mxu0 %v2425_v19  ;;  %v2457_v17 = vld [vmem:[%s3398_s25] sm:$0xff]   ;;  %v2459_v19 = vld [vmem:[%s3398_s25 + $0x8] sm:$0xff]  }
 0x4ec   : > { %1585 = vmatprep.mubr.bf16.mxu1 %v2877_v2  ;;  %2198 = vmatprep.subr.bf16.mxu0 %v2876_v1  ;;  %v2427_v2 = vld [vmem:[%s3391_s19 + $0x18] sm:$0xff]   ;;  %s3738_s19 = sld [smem:[#allocation29_spill]] }
 0x4ed   : > { %1554 = vmatpush1.bf16.msra.mxu1 %v2432_v60 }
 0x4ee   : > { %1555 = vmatprep.subr.bf16.mxu1 %v2437_v62 }
 0x4ef   : > { %2199 = vmatpush3.bf16.msra.mxu0 %v2426_v23  ;;  %v2463_v23 = vld [vmem:[%s3398_s25 + $0x18] sm:$0xff]  }
 0x4f0   : > { %2200 = vmatprep.subr.bf16.mxu0 %v2876_v1 }
 0x4f1   : > { %1556 = vmatpush1.bf16.msra.mxu1 %v2435_v63  ;;  %v1601_v63 = vrot.slane %v3432_v36, %v1600_v61 }
 0x4f2   : > { %1557 = vmatprep.subr.bf16.mxu1 %v2440_v0  ;;  %p3740_p4 = scmp.ne.s32.totalorder %s3738_s19, 0 }
 0x4f3   : > { %2201 = vmatpush3.bf16.msra.mxu0 %v2427_v2  ;;  %v2465_v2 = vld [vmem:[%s3398_s25 + $0x20] sm:$0xff]  }
 0x4f4   : > { %2202 = vmatprep.subr.bf16.mxu0 %v2876_v1  ;;  %p2722_p0 = pnand %p2721_p13, %p3740_p4 }
 0x4f6   : > { %p2723_p5 = pneg %p2722_p0 }
 0x4f7   : > { %2203 = vmatpush3.bf16.msra.mxu0 %v2428_v25  ;;  %v2466_v25 = vld [vmem:[%s3398_s25 + $0x68] sm:$0xff]  }
 0x4f8   : > { %2204 = vmatprep.subr.bf16.mxu0 %v2876_v1 }
 0x4fb   : > { %2205 = vmatpush3.bf16.msra.mxu0 %v2429_v26  ;;  %v2467_v26 = vld [vmem:[%s3398_s25 + $0x28] sm:$0xff]  }
 0x4fc   : > { %2206 = vmatprep.subr.bf16.mxu0 %v2876_v1 }
 0x4ff   : > { %2207 = vmatpush3.bf16.msra.mxu0 %v2430_v27 }
 0x500   : > { %2208 = vmatprep.subr.bf16.mxu0 %v2876_v1 }
 0x503   : > { %2209 = vmatpush3.bf16.msra.mxu0 %v2431_v37 }
 0x504   : > { %2104 = vmatprep.subr.bf16.mxu0 %v2456_v16 }
 0x545   : > { %v1184_v20 = vpop.f32.mrb[4].mxu0 }
 0x546   : > { %v2174_v21 = vpop.f32.mrb[5].mxu0 }
 0x547   : > { %v1187_v22 = vpop.f32.mrb[6].mxu0  ;;  %v2461_v21 = vld [vmem:[%s3398_s25 + $0x10] sm:$0xff]  }
 0x548   : > { %v2175_v24 = vpop.f32.mrb[7].mxu0  ;;  %v2462_v22 = vld [vmem:[%s3398_s25 + $0x58] sm:$0xff]  }
 0x549   : > { %v2464_v24 = vld [vmem:[%s3398_s25 + $0x60] sm:$0xff]  }
 0x5ae   : > { %v1230_v29 = vpop.f32.mrb[20].mxu1 }
 0x5af   : > { %1329 = vrot.lane.b32.xlu1 %v1230_v29, %s2881_s16  ;;  %v2180_v30 = vpop.f32.mrb[21].mxu1 }
 0x5b0   : > { %v1233_v31 = vpop.f32.mrb[22].mxu1 }
 0x5b1   : > { %v2181_v34 = vpop.f32.mrb[23].mxu1  ;;  %v1453_v31 = vsub.s32 2, %v3418_v32 }
 0x5b2   : > { %v1458_v34 = vsub.s32 3, %v3418_v32 }
 0x5b3   : > { %v1454_v37 = vrot.slane %v3432_v36, %v1453_v31 }
 0x5b9   : > { %v1276_v38 = vpop.f32.mrb[8].mxu0 }
 0x5ba   : > { %1333 = vrot.lane.b32.xlu0 %v1276_v38, %s2879_s1  ;;  %v2186_v39 = vpop.f32.mrb[9].mxu0  ;;  %s2882_s1 = smov [#allocation16]  }
 0x5bb   : > { %v1279_v40 = vpop.f32.mrb[10].mxu0 }
 0x5bc   : > { %v2187_v41 = vpop.f32.mrb[11].mxu0  ;;  %v1459_v40 = vrot.slane %v3432_v36, %v1458_v34 }
 0x5be   : > { %v1322_v42 = vpop.f32.mrb[24].mxu1 }
 0x5bf   : > { %1337 = vrot.lane.b32.xlu1 %v1322_v42, %s2880_s4  ;;  %v2192_v43 = vpop.f32.mrb[25].mxu1  ;;  %s2724_s4 = sshll.u32 %s2882_s1, 4  ;;  %s2725_s4 = int_to_ptr.vmem [resolvable:$false] %s2724_s4 }
 0x5c0   : > { %v1325_v45 = vpop.f32.mrb[26].mxu1  ;;  %s2726_s16 = scalar_lea.vmem %s2725_s4, 256  ;;  %p2727_p10 = scmp.lt.s32.totalorder %s3581_s30, %s2725_s4 }
 0x5c1   : > { %v2193_v46 = vpop.f32.mrb[27].mxu1  ;;  %v2468_v45 = vld [vmem:[%s3398_s25 + $0x70] sm:$0xff]   ;;  %p2728_p8 = scmp.lt.s32.totalorder %s2726_s16, %s2720_s13 }
 0x5c2   : > { %v2469_v46 = vld [vmem:[%s3398_s25 + $0x30] sm:$0xff]  }
 0x5c3   : > { %p2729_p11 = por %p2728_p8, %p2727_p10 }
 0x5c5   : > { %p2730_p1 = pnand %p2729_p11, %p2723_p5 }
 0x621   : > { %v1330_v47 = vpop.permute.xlu1 %1329 }
 0x622   : > { %v1340_v1 = vsel %vm909_vm1, %v1184_v20, %v1330_v47  ;;  %v2460_v20 = vld [vmem:[%s3398_s25 + $0x50] sm:$0xff]   ;;  %v2470_v47 = vld [vmem:[%s3398_s25 + $0x78] sm:$0xff]  }
 0x62c   : > { %v1334_v48 = vpop.permute.xlu0 %1333 }
 0x62d   : > { %v1342_v49 = vsel %vm1341_vm4, %v1340_v1, %v1334_v48  ;;  %v2471_v48 = vld [vmem:[%s3398_s25 + $0x38] sm:$0xff]   ;;  %v639_v1 = vld [vmem:[%s638_s2] sm:$0x3]  ;;  %s2062_s25 = sshll.u32 %s3737_s27, 7 }
 0x62e   : > { %s3579_s7 = scalar_lea.hbm %s3739_s5, %s2062_s25 }
 0x631   : > { %v1338_v50 = vpop.permute.xlu1 %1337 }
 0x632   : > { %v1344_v51 = vsel %vm1343_vm5, %v1342_v49, %v1338_v50  ;;  %v1466_v49 = vrot.slane %v639_v1, %v3427_v33  ;;  %v1470_v50 = vrot.slane %v639_v1, %v3430_v35 }
 0x633   : > { %v1345_v52 = vpack.c.bf16 %v1344_v51, %v1344_v51 }
 0x635   : > { %2211 = vmatmul.mubr.bf16.vlgmr.msra.gmra.mrb[12].mxu0 %v1345_v52 }
 0x636   : > { %2105 = vmatpush3.bf16.msra.mxu0 %v2457_v17 }
 0x637   : > { %2106 = vmatprep.subr.bf16.mxu0 %v2458_v18 }
 0x63a   : > { %2107 = vmatpush3.bf16.msra.mxu0 %v2459_v19 }
 0x63b   : > { %2108 = vmatprep.subr.bf16.mxu0 %v2460_v20 }
 0x63e   : > { %2109 = vmatpush3.bf16.msra.mxu0 %v2461_v21 }
 0x63f   : > { %2110 = vmatprep.subr.bf16.mxu0 %v2462_v22 }
 0x642   : > { %2111 = vmatpush3.bf16.msra.mxu0 %v2463_v23 }
 0x643   : > { %2112 = vmatprep.subr.bf16.mxu0 %v2464_v24 }
 0x646   : > { %2113 = vmatpush3.bf16.msra.mxu0 %v2465_v2 }
 0x647   : > { %2114 = vmatprep.subr.bf16.mxu0 %v2466_v25 }
 0x64a   : > { %2115 = vmatpush3.bf16.msra.mxu0 %v2467_v26 }
 0x64b   : > { %2116 = vmatprep.subr.bf16.mxu0 %v2468_v45 }
 0x64e   : > { %2117 = vmatpush3.bf16.msra.mxu0 %v2469_v46 }
 0x64f   : > { %2118 = vmatprep.subr.bf16.mxu0 %v2470_v47 }
 0x652   : > { %2119 = vmatpush3.bf16.msra.mxu0 %v2471_v48 }
 0x708   : > { %v1432_v54 = vpop.f32.mrb[12].mxu0 }
 0x709   : > { %v1433_v55 = vadd.f32 %v1432_v54, %v1349_v53  ;;  %v2212_v56 = vpop.f32.mrb[13].mxu0 }
 0x70a   : > { %v1435_v57 = vpop.f32.mrb[14].mxu0 }
 0x70b   : > { %v2213_v58 = vpop.f32.mrb[15].mxu0  ;;  %v1438_v59 = vadd.f32 %v1433_v55, %v3406_v28  ;;  %v2438_v28 = vld [vmem:[%s3523_s12 + $0x20] ss:$8 sps:$4 sm:$0xff]  }
 0x70c   : > { %1558 = vmatpush1.bf16.msra.mxu1 %v2438_v28 }
 0x70d   : > { %1439 = vadd.xlane.f32.xlu0 %v1438_v59  ;;  %1559 = vmatprep.subr.bf16.mxu1 %v2443_v7 }
 0x710   : > { %1560 = vmatpush1.bf16.msra.mxu1 %v2441_v8 }
 0x711   : > { %1561 = vmatprep.subr.bf16.mxu1 %v2446_v44 }
 0x714   : > { %1562 = vmatpush1.bf16.msra.mxu1 %v2444_v9 }
 0x715   : > { %1563 = vmatprep.subr.bf16.mxu1 %v2449_v10 }
 0x718   : > { %1564 = vmatpush1.bf16.msra.mxu1 %v2447_v11  ;;  %v1752_v11 = vsub.s32 4, %v3418_v32 }
 0x719   : > { %1565 = vmatprep.subr.bf16.mxu1 %v2452_v12  ;;  %v1757_v12 = vsub.s32 5, %v3418_v32 }
 0x71b   : > { %v1758_v16 = vrot.slane %v3432_v36, %v1757_v12 }
 0x71c   : > { %1566 = vmatpush1.bf16.msra.mxu1 %v2450_v13  ;;  %v1753_v13 = vrot.slane %v3432_v36, %v1752_v11 }
 0x71d   : > { %1567 = vmatprep.subr.bf16.mxu1 %v2455_v14 }
 0x720   : > { %1568 = vmatpush1.bf16.msra.mxu1 %v2453_v15 }
 0x79a   : > { %v1440_v3 = vpop.xlane.xlu0 %1439 }
 0x79b   : > { %v1442_v4 = vmul.f32 0.0078125, %v1440_v3 }
 0x79d   : > { %v1443_v5 = vsub.f32 %v1438_v59, %v1442_v4 }
 0x79f   : > { %v1444_v6 = vmul.f32 %v1443_v5, %v1443_v5 }
 0x7a1   : > { %1445 = vadd.xlane.f32.xlu1 %v1444_v6 }
 0x82e   : > { %v1446_v27 = vpop.xlane.xlu1 %1445 }
 0x82f   : > { %v1447_v29 = vmul.f32 0.0078125, %v1446_v27 }
 0x831   : > { %v1448_v30 = vadd.f32 1e-05, %v1447_v29 }
 0x833   : > { %2488 = vrsqrt.f32 %v1448_v30 }
 0x83d   : > { %v2489_v38 = vpop.eup %2488 }
 0x83e   : > { %v1450_v39 = vmul.f32 %v2489_v38, %v1443_v5 }
 0x840   : > { %v1455_v41 = vmul.f32 %v1454_v37, %v1450_v39 }
 0x842   : > { %v1460_v42 = vadd.f32 %v1459_v40, %v1455_v41 }
 0x844   : > { %v1461_v43 = vpack.c.bf16 %v1460_v42, %v1460_v42 }
 0x846   : > { %1586 = vmatmul.mubr.bf16.vlgmr.msra.gmra.mrb[28].mxu1 %v1461_v43 }
 0x919   : > { %v1587_v51 = vpop.f32.mrb[28].mxu1 }
 0x91a   : > { %v1588_v52 = vadd.f32 %v1587_v51, %v1466_v49  ;;  %v1589_v53 = vpop.f32.mrb[29].mxu1 }
 0x91b   : > { %v1590_v54 = vadd.f32 %v1589_v53, %v1470_v50  ;;  %v1591_v55 = vpop.f32.mrb[30].mxu1 }
 0x91c   : > { %v1594_v56 = vmax.f32 %v1588_v52, 0.0  ;;  %v1592_v57 = vpop.f32.mrb[31].mxu1 }
 0x91d   : > { %v1595_v58 = vmax.f32 %v1590_v54, 0.0 }
 0x91e   : > { %v1596_v60 = vpack.c.bf16 %v1594_v56, %v1594_v56 }
 0x91f   : > { %v1597_v59 = vpack.c.bf16 %v1595_v58, %v1595_v58 }
 0x921   : > { %1730 = vmatprep.mubr.bf16.mxu0 %v1597_v59 }
 0x922   : > { %1731 = vmatmul.mubr.bf16.vlgmr.msra.gmra.mrb[16].mxu0 %v1596_v60 }
 0x9f5   : > { %v2120_v62 = vpop.f32.mrb[16].mxu0 }
 0x9f6   : > { %v2121_v33 = vpop.f32.mrb[17].mxu0 }
 0x9f7   : > { %v2122_v0 = vadd.f32 %v2121_v33, %v2120_v62  ;;  %v2123_v35 = vpop.f32.mrb[18].mxu0 }
 0x9f8   : > { %v2124_v28 = vpop.f32.mrb[19].mxu0 }
 0x9f9   : > { %v1733_v3 = vadd.f32 %v2122_v0, %v1601_v63 }
 0x9fb   : > { %v1738_v4 = vadd.f32 %v1733_v3, %v1460_v42 }
 0x9fd   : > { %1739 = vadd.xlane.f32.xlu0 %v1738_v4 }
 0xa8a   : > { %v1740_v5 = vpop.xlane.xlu0 %1739 }
 0xa8b   : > { %v1741_v6 = vmul.f32 0.0078125, %v1740_v5 }
 0xa8d   : > { %v1742_v7 = vsub.f32 %v1738_v4, %v1741_v6 }
 0xa8f   : > { %v1743_v8 = vmul.f32 %v1742_v7, %v1742_v7 }
 0xa91   : > { %1744 = vadd.xlane.f32.xlu0 %v1743_v8 }
 0xb1e   : > { %v1745_v44 = vpop.xlane.xlu0 %1744 }
 0xb1f   : > { %v1746_v9 = vmul.f32 0.0078125, %v1745_v44 }
 0xb21   : > { %v1747_v10 = vadd.f32 1e-05, %v1746_v9 }
 0xb23   : > { %2490 = vrsqrt.f32 %v1747_v10 }
 0xb2d   : > { %v2491_v14 = vpop.eup %2490 }
 0xb2e   : > { %v1749_v15 = vmul.f32 %v2491_v14, %v1742_v7 }
 0xb30   : > { %v1754_v17 = vmul.f32 %v1753_v13, %v1749_v15 }
 0xb32   : > { %v1759_v18 = vadd.f32 %v1758_v16, %v1754_v17 }
 0xb34   : > { %1760 = vst [vmem:[%s3347_s8] sm:$0xff] %v1759_v18 }
 0xb35   : > { %2733 = shalt.err (!%p2730_p1)
}
 0xb36   : > { %s2734_s29 = scalar_lea.hbm %s3579_s7, 128  ;;  %s2738_s9 = scalar_lea.hbm %s3739_s5, 256 }
 0xb37   : > { %p2735_p3 = scmp.ne.s32.totalorder %s3579_s7, %s2734_s29  ;;  %p2739_p6 = scmp.lt.u32.totalorder %s3579_s7, %s3739_s5 }
 0xb38   : > { %p2740_p9 = scmp.lt.u32.totalorder %s2738_s9, %s2734_s29  ;;  %p2742_p13 = scmp.lt.u32.totalorder %s2734_s29, %s3579_s7 }
 0xb39   : > { %p2736_p2 = pnand %p2735_p3, %p3740_p4 }
 0xb3a   : > { %p2741_p12 = por %p2740_p9, %p2739_p6 }
 0xb3b   : > { %p2737_p7 = pneg %p2736_p2 }
 0xb3c   : > { %p2743_p0 = por %p2742_p13, %p2741_p12 }
 0xb3e   : > { %p2744_p5 = pnand %p2743_p0, %p2737_p7 }
 0xb40   : > { %2747 = shalt.err (!%p2744_p5)
}
 0xb41   : > { %2242 = dma.vmem_to_hbm [thread:$0]  (%p3740_p4), %s3581_s30, 128, %s3579_s7, %s1762_s6  }
 0xb42 PF: > { %s3741_s2 = sld [smem:[#allocation25_spill]]  ;;  %s3742_s27 = sld [smem:[#allocation30_spill]] }
 0xb43   : > { %p2287_p10 = scmp.ge.s32.totalorder %s2862_s23, 2 }
 0xb48   : > { %s1787_s25 = sand.u32 1, %s3741_s2   ;;  %p3743_p8 = scmp.ne.s32.totalorder %s3742_s27, 0 }
 0xb49   : > { %s1788_s10 = scalar_lea.sflag [#allocation4], %s1787_s25 }
 0xb4a   : > { %p2271_p11 = pnand %p2287_p10, %p3743_p8 }
 0xb4c   : > { %2817 = dma.done.wait (!%p2271_p11), %s1788_s10, 128  }
 0xb4d   : > { %2819 = vsyncadd (!%p2271_p11), %s1788_s10, 4294967168  ;;  %s32_s23 = sadd.s32 1, %s2862_s23   ;;  %s3744_s30 = sld [smem:[#allocation31_spill]] }
 0xb4e   : > { %p29_p1 = scmp.ge.s32.totalorder %s32_s23, 10   ;;  %s3745_s13 = smov %s2826_s14 }
 0xb4f   : > { %s3746_s14 = smov %s2830_s15  ;;  %s3747_s15 = smov %s3268_s3 }
 0xb50   : > { %s3748_s16 = smov %s2838_s17  ;;  %s3749_s17 = smov %s2842_s18 }
 0xb51   : > { %s3750_s18 = smov %s3265_s0  ;;  %s3751_s19 = smov %s2854_s21 }
 0xb52   : > { %s3752_s20 = smov %s2858_s22  ;;  %s3754_s22 = smov %s3760_s26 }
 0xb53   : > { %s3753_s21 = smov %s3744_s30  ;;  %31 = sbr.rel (!%p29_p1) target bundleno = 26 (0x1a), region = 154 }
 0xb5a   :  { %1793 = vsyncpa [#allocation3], 1 }
 0xb5b   :  { %1795 = vsyncpa [#allocation3 + $0x1], 1 }
 0xb5c   :  { %1796 = vsyncpa [#allocation6], 1 }
 0xb5d   :  { %1798 = vsyncpa [#allocation6 + $0x1], 1 }
 0xb5e   :  { %1799 = vsyncpa [#allocation9], 1 }
 0xb5f   :  { %1800 = vsyncpa [#allocation12], 1 }
 0xb60   :  { %1801 = vsyncpa [#allocation15], 1 }
 0xb61   :  { %1802 = vsyncpa [#allocation4], 1 }
 0xb62   :  { %1804 = vsyncpa [#allocation4 + $0x1], 1 }

</bundles_post_ra>
